<compile_context>
chip_gen: v6e
topology: v6e:2x2x1
jax: 0.10.0
libtpu: 0.0.40
codegen_flags: <defaults>
</compile_context>

<pallas_src>
import functools
import math

import jax
import jax.numpy as jnp
import numpy as np
from jax.experimental import pallas as pl
from jax.experimental.pallas import tpu as pltpu


def dkt_kernel(*refs, num_layers, hidden, steps, batch_pad):
    # refs = (x2d, q2d, [w_ih_l, w_hh_l, b_l] * num_layers, w1_pad, w2_pad,
    #         fc_b, out)
    x_ref, q_ref = refs[0], refs[1]
    lstm_refs = refs[2:2 + 3 * num_layers]
    w1_ref = refs[2 + 3 * num_layers]          # (H, 128) bf16, fc col 0 real
    w2_ref = refs[3 + 3 * num_layers]          # (H, 128) bf16, fc col 0 real
    fcb_ref = refs[4 + 3 * num_layers]         # (1, 1) f32
    out_ref = refs[5 + 3 * num_layers]         # (T*B_pad, 128) f32

    H = hidden
    B = batch_pad
    T = steps
    G = 4 * H

    # ---- Hoisted constants (PyTorch gate order i, f, g, o; tanh on g). ----
    lane = jax.lax.broadcasted_iota(jnp.int32, (B, G), 1)
    g_lanes = (lane >= 2 * H) & (lane < 3 * H)
    # sigmoid(x) = 0.5 * tanh(0.5 * x) + 0.5  ->  one tanh pass per step.
    pre_scale = jnp.where(g_lanes, 1.0, 0.5).astype(jnp.float32)   # also post
    post_shift = jnp.where(g_lanes, 0.0, 0.5).astype(jnp.float32)

    w_ih = [lstm_refs[3 * l][...] for l in range(num_layers)]       # bf16 (D,4H)
    w_hh = [lstm_refs[3 * l + 1][...] for l in range(num_layers)]   # bf16 (H,4H)
    b_raw = [lstm_refs[3 * l + 2][...] for l in range(num_layers)]  # f32  (1,4H)
    # Hoisted bias broadcasts for layers >= 1 (layer 0 bias folds into xp0).
    bias = [None] + [jnp.broadcast_to(b_raw[l], (B, G))
                     for l in range(1, num_layers)]
    w1 = w1_ref[...]                                                # bf16 (H,128)

    # Layer-0 input projection hoisted over all timesteps: one MXU matmul.
    xp0 = jnp.dot(x_ref[...], w_ih[0],
                  preferred_element_type=jnp.float32) + b_raw[0]    # (T*B, 4H)

    # Query half of the FC + bias hoisted (no LSTM dependence).
    qproj = jnp.dot(q_ref[...], w2_ref[...],
                    preferred_element_type=jnp.float32) + fcb_ref[...]  # (T*B,128)

    def gate_act(gates):
        th = jnp.tanh(gates * pre_scale)          # single EUP pass, full vreg
        return th * pre_scale + post_shift        # i/f/o -> sigmoid, g -> tanh

    c = [jnp.zeros((B, H), jnp.float32) for _ in range(num_layers)]
    h_bf = [jnp.zeros((B, H), jnp.bfloat16) for _ in range(num_layers)]

    # Wavefront recurrence: static unroll (T, L tiny) -> one basic block the
    # LLO scheduler can interleave across layers.
    for t in range(T):
        inp_bf = None
        for l in range(num_layers):
            rec = jnp.dot(h_bf[l], w_hh[l], preferred_element_type=jnp.float32)
            if l == 0:
                gates = xp0[t * B:(t + 1) * B, :] + rec
            else:
                gates = (jnp.dot(inp_bf, w_ih[l],
                                 preferred_element_type=jnp.float32)
                         + bias[l] + rec)
            act = gate_act(gates)
            i_g = act[:, 0 * H:1 * H]
            f_g = act[:, 1 * H:2 * H]
            g_g = act[:, 2 * H:3 * H]
            o_g = act[:, 3 * H:4 * H]
            c[l] = f_g * c[l] + i_g * g_g
            h_new = o_g * jnp.tanh(c[l])
            h_bf[l] = h_new.astype(jnp.bfloat16)
            inp_bf = h_bf[l]
        # FC fused into the loop: lane-dense, sublane-aligned (B, 128) store.
        logit = (jnp.dot(inp_bf, w1, preferred_element_type=jnp.float32)
                 + qproj[t * B:(t + 1) * B, :])
        out_ref[t * B:(t + 1) * B, :] = 0.5 * jnp.tanh(0.5 * logit) + 0.5


def dkt_forward(x, query_embedding, lstm_params, fc_w, fc_b, *, hidden):
    """lstm_params: list of (w_ih (D,4H), w_hh (H,4H), b (1,4H)) per layer."""
    batch, steps, _ = x.shape
    num_layers = len(lstm_params)
    H = hidden
    B_pad = ((batch + 7) // 8) * 8             # pad batch to full sublanes
    LANE_PAD = 128                             # lane-dense output width

    def to_time_major_2d(a, dtype):
        a = jnp.swapaxes(a.astype(jnp.float32), 0, 1)          # (T, B, D)
        a = jnp.pad(a, ((0, 0), (0, B_pad - batch), (0, 0)))   # (T, B_pad, D)
        return a.reshape(steps * B_pad, a.shape[-1]).astype(dtype)

    # bf16 MXU operands; f32 accumulation happens inside the kernel.
    x2d = to_time_major_2d(x, jnp.bfloat16)
    q2d = to_time_major_2d(query_embedding, jnp.bfloat16)

    # Lane-pad FC weight columns (column 0 carries the real weight).
    w1 = jnp.zeros((H, LANE_PAD), jnp.float32).at[:, 0].set(
        fc_w[0, :H]).astype(jnp.bfloat16)
    w2 = jnp.zeros((H, LANE_PAD), jnp.float32).at[:, 0].set(
        fc_w[0, H:]).astype(jnp.bfloat16)

    flat_weights = []
    for (w_ih, w_hh, b) in lstm_params:
        flat_weights += [w_ih.astype(jnp.bfloat16), w_hh.astype(jnp.bfloat16),
                         b.astype(jnp.float32)]

    kernel = functools.partial(dkt_kernel, num_layers=num_layers, hidden=H,
                               steps=steps, batch_pad=B_pad)
    n_inputs = 2 + 3 * num_layers + 3
    vmem_spec = pl.BlockSpec(memory_space=pltpu.MemorySpace.VMEM)

    out = pl.pallas_call(
        kernel,
        out_shape=jax.ShapeDtypeStruct((steps * B_pad, LANE_PAD), jnp.float32),
        in_specs=[vmem_spec] * n_inputs,
        out_specs=vmem_spec,
    )(x2d, q2d, *flat_weights, w1, w2, fc_b.astype(jnp.float32))

    # Column 0 holds sigmoid(logits) in time-major order; crop padding and
    # return batch-first (B, T) to match PyTorch `res.squeeze()`.
    res = out[:, 0].reshape(steps, B_pad)[:, :batch]
    return jnp.swapaxes(res, 0, 1)


def dkt_reference(x, query_embedding, lstm_params, fc_w, fc_b, *, hidden):
    """Pure-JAX f32 reference (same math as the PyTorch module)."""
    batch = x.shape[0]
    layer_in = x
    for (w_ih, w_hh, b) in lstm_params:
        def step(carry, x_t):
            h, c = carry
            gates = x_t @ w_ih + h @ w_hh + b
            i = jax.nn.sigmoid(gates[:, 0 * hidden:1 * hidden])
            f = jax.nn.sigmoid(gates[:, 1 * hidden:2 * hidden])
            g = jnp.tanh(gates[:, 2 * hidden:3 * hidden])
            o = jax.nn.sigmoid(gates[:, 3 * hidden:4 * hidden])
            c = f * c + i * g
            h = o * jnp.tanh(c)
            return (h, c), h
        init = (jnp.zeros((batch, hidden), jnp.float32),
                jnp.zeros((batch, hidden), jnp.float32))
        _, hs = jax.lax.scan(step, init, jnp.swapaxes(layer_in, 0, 1))
        layer_in = jnp.swapaxes(hs, 0, 1)
    cat = jnp.concatenate([layer_in, query_embedding], axis=-1)   # (B, T, 2H)
    logit = jnp.einsum("btk,k->bt", cat, fc_w[0]) + fc_b[0, 0]
    return jax.nn.sigmoid(logit)


if __name__ == "__main__":
    # Module hyperparams (small, consistent with the forward's assertions).
    INPUT_SIZE = 32
    HIDDEN = 32
    NUM_LAYERS = 2
    MAX_STEPS = 8
    BATCH = 2
    T = MAX_STEPS - 1

    key = jax.random.PRNGKey(0)
    keys = iter(jax.random.split(key, 32))
    scale = 1.0 / math.sqrt(HIDDEN)

    def uni(shape):
        return jax.random.uniform(next(keys), shape, jnp.float32, -scale, scale)

    # Deterministic synthetic parameters (PyTorch-LSTM shapes, stored transposed).
    lstm_params = []
    for layer in range(NUM_LAYERS):
        d_in = INPUT_SIZE if layer == 0 else HIDDEN
        w_ih = uni((d_in, 4 * HIDDEN))      # == weight_ih_l{layer}.T
        w_hh = uni((HIDDEN, 4 * HIDDEN))    # == weight_hh_l{layer}.T
        b = uni((1, 4 * HIDDEN))            # == (bias_ih + bias_hh)
        lstm_params.append((w_ih, w_hh, b))
    fc_w = uni((1, 2 * HIDDEN))             # nn.Linear(2H, 1).weight
    fc_b = uni((1, 1))                      # nn.Linear(2H, 1).bias

    x = jax.random.normal(next(keys), (BATCH, T, INPUT_SIZE), jnp.float32)
    query_embedding = jax.random.normal(next(keys), (BATCH, T, HIDDEN), jnp.float32)

    out = dkt_forward(x, query_embedding, lstm_params, fc_w, fc_b, hidden=HIDDEN)
    out = jax.block_until_ready(out)
    assert out.shape == (BATCH, T)

    ref = dkt_reference(x, query_embedding, lstm_params, fc_w, fc_b, hidden=HIDDEN)
    # Tolerance relaxed vs. the f32-matmul version because MXU operands are now
    # bf16 (f32 accumulation); error compounds over 7 steps x 2 layers.
    np.testing.assert_allclose(np.asarray(out), np.asarray(ref), atol=1e-2, rtol=1e-2)

    print("KERNEL_OK")
</pallas_src>

<mosaic_0001>
module attributes {stable_mosaic.version = 11 : i64} {
  func.func @dkt_kernel(%arg0: memref<56x32xbf16, #tpu.memory_space<vmem>>, %arg1: memref<56x32xbf16, #tpu.memory_space<vmem>>, %arg2: memref<32x128xbf16, #tpu.memory_space<vmem>>, %arg3: memref<32x128xbf16, #tpu.memory_space<vmem>>, %arg4: memref<1x128xf32, #tpu.memory_space<vmem>>, %arg5: memref<32x128xbf16, #tpu.memory_space<vmem>>, %arg6: memref<32x128xbf16, #tpu.memory_space<vmem>>, %arg7: memref<1x128xf32, #tpu.memory_space<vmem>>, %arg8: memref<32x128xbf16, #tpu.memory_space<vmem>>, %arg9: memref<32x128xbf16, #tpu.memory_space<vmem>>, %arg10: memref<1x1xf32, #tpu.memory_space<vmem>>, %arg11: memref<56x128xf32, #tpu.memory_space<vmem>>) attributes {dimension_semantics = [], scalar_prefetch = 0 : i64, scratch_operands = 0 : i64, tpu.core_type = #tpu.core_type<tc>} {
    %0 = tpu.iota {dimensions = array<i32: 1>} : vector<8x128xi32>
    %c64_i32 = arith.constant 64 : i32
    %1 = vector.broadcast %c64_i32 : i32 to vector<8x128xi32>
    %2 = arith.cmpi sge, %0, %1 : vector<8x128xi32>
    %c96_i32 = arith.constant 96 : i32
    %3 = vector.broadcast %c96_i32 : i32 to vector<8x128xi32>
    %4 = arith.cmpi slt, %0, %3 : vector<8x128xi32>
    %5 = arith.andi %2, %4 : vector<8x128xi1>
    %cst = arith.constant 1.000000e+00 : f32
    %cst_0 = arith.constant 5.000000e-01 : f32
    %6 = vector.broadcast %cst : f32 to vector<8x128xf32>
    %7 = vector.broadcast %cst_0 : f32 to vector<8x128xf32>
    %8 = arith.select %5, %6, %7 : vector<8x128xi1>, vector<8x128xf32>
    %cst_1 = arith.constant 0.000000e+00 : f32
    %cst_2 = arith.constant 5.000000e-01 : f32
    %9 = vector.broadcast %cst_1 : f32 to vector<8x128xf32>
    %10 = vector.broadcast %cst_2 : f32 to vector<8x128xf32>
    %11 = arith.select %5, %9, %10 : vector<8x128xi1>, vector<8x128xf32>
    %c0 = arith.constant 0 : index
    %c0_3 = arith.constant 0 : index
    %12 = vector.load %arg2[%c0, %c0_3] : memref<32x128xbf16, #tpu.memory_space<vmem>>, vector<32x128xbf16>
    %c0_4 = arith.constant 0 : index
    %c0_5 = arith.constant 0 : index
    %13 = vector.load %arg5[%c0_4, %c0_5] : memref<32x128xbf16, #tpu.memory_space<vmem>>, vector<32x128xbf16>
    %c0_6 = arith.constant 0 : index
    %c0_7 = arith.constant 0 : index
    %14 = vector.load %arg3[%c0_6, %c0_7] : memref<32x128xbf16, #tpu.memory_space<vmem>>, vector<32x128xbf16>
    %c0_8 = arith.constant 0 : index
    %c0_9 = arith.constant 0 : index
    %15 = vector.load %arg6[%c0_8, %c0_9] : memref<32x128xbf16, #tpu.memory_space<vmem>>, vector<32x128xbf16>
    %c0_10 = arith.constant 0 : index
    %c0_11 = arith.constant 0 : index
    %16 = vector.load %arg4[%c0_10, %c0_11] : memref<1x128xf32, #tpu.memory_space<vmem>>, vector<1x128xf32>
    %c0_12 = arith.constant 0 : index
    %c0_13 = arith.constant 0 : index
    %17 = vector.load %arg7[%c0_12, %c0_13] : memref<1x128xf32, #tpu.memory_space<vmem>>, vector<1x128xf32>
    %18 = vector.shape_cast %17 : vector<1x128xf32> to vector<1x128xf32>
    %19 = vector.broadcast %18 : vector<1x128xf32> to vector<8x128xf32>
    %c0_14 = arith.constant 0 : index
    %c0_15 = arith.constant 0 : index
    %20 = vector.load %arg8[%c0_14, %c0_15] : memref<32x128xbf16, #tpu.memory_space<vmem>>, vector<32x128xbf16>
    %c0_16 = arith.constant 0 : index
    %c0_17 = arith.constant 0 : index
    %21 = vector.load %arg0[%c0_16, %c0_17] : memref<56x32xbf16, #tpu.memory_space<vmem>>, vector<56x32xbf16>
    %cst_18 = arith.constant dense<0.000000e+00> : vector<56x128xf32>
    %22 = tpu.matmul %21, %12, %cst_18 {dimension_numbers = #tpu.dot_dimension_numbers<[1], [0], [0], [1], [0, 0, 1, 1], [], []>} : vector<56x32xbf16>, vector<32x128xbf16>, vector<56x128xf32> -> vector<56x128xf32>
    %23 = vector.broadcast %16 : vector<1x128xf32> to vector<56x128xf32>
    %24 = arith.addf %22, %23 : vector<56x128xf32>
    %c0_19 = arith.constant 0 : index
    %c0_20 = arith.constant 0 : index
    %25 = vector.load %arg1[%c0_19, %c0_20] : memref<56x32xbf16, #tpu.memory_space<vmem>>, vector<56x32xbf16>
    %c0_21 = arith.constant 0 : index
    %c0_22 = arith.constant 0 : index
    %26 = vector.load %arg9[%c0_21, %c0_22] : memref<32x128xbf16, #tpu.memory_space<vmem>>, vector<32x128xbf16>
    %cst_23 = arith.constant dense<0.000000e+00> : vector<56x128xf32>
    %27 = tpu.matmul %25, %26, %cst_23 {dimension_numbers = #tpu.dot_dimension_numbers<[1], [0], [0], [1], [0, 0, 1, 1], [], []>} : vector<56x32xbf16>, vector<32x128xbf16>, vector<56x128xf32> -> vector<56x128xf32>
    %c0_24 = arith.constant 0 : index
    %c0_25 = arith.constant 0 : index
    %28 = vector.load %arg10[%c0_24, %c0_25] : memref<1x1xf32, #tpu.memory_space<vmem>>, vector<1x1xf32>
    %29 = vector.broadcast %28 : vector<1x1xf32> to vector<56x128xf32>
    %30 = arith.addf %27, %29 : vector<56x128xf32>
    %cst_26 = arith.constant 0.000000e+00 : f32
    %31 = vector.broadcast %cst_26 : f32 to vector<8x32xf32>
    %cst_27 = arith.constant 0.000000e+00 : f32
    %32 = vector.broadcast %cst_27 : f32 to vector<8x32xf32>
    %cst_28 = arith.constant 0.000000e+00 : bf16
    %33 = vector.broadcast %cst_28 : bf16 to vector<8x32xbf16>
    %cst_29 = arith.constant 0.000000e+00 : bf16
    %34 = vector.broadcast %cst_29 : bf16 to vector<8x32xbf16>
    %cst_30 = arith.constant dense<0.000000e+00> : vector<8x128xf32>
    %35 = tpu.matmul %33, %14, %cst_30 {dimension_numbers = #tpu.dot_dimension_numbers<[1], [0], [0], [1], [0, 0, 1, 1], [], []>} : vector<8x32xbf16>, vector<32x128xbf16>, vector<8x128xf32> -> vector<8x128xf32>
    %36 = vector.extract_strided_slice %24 {offsets = [0, 0], sizes = [8, 128], strides = [1, 1]} : vector<56x128xf32> to vector<8x128xf32>
    %37 = arith.addf %36, %35 : vector<8x128xf32>
    %38 = arith.mulf %37, %8 : vector<8x128xf32>
    %39 = math.tanh %38 : vector<8x128xf32>
    %40 = arith.mulf %39, %8 : vector<8x128xf32>
    %41 = arith.addf %40, %11 : vector<8x128xf32>
    %42 = vector.extract_strided_slice %41 {offsets = [0, 0], sizes = [8, 32], strides = [1, 1]} : vector<8x128xf32> to vector<8x32xf32>
    %43 = vector.extract_strided_slice %41 {offsets = [0, 32], sizes = [8, 32], strides = [1, 1]} : vector<8x128xf32> to vector<8x32xf32>
    %44 = vector.extract_strided_slice %41 {offsets = [0, 64], sizes = [8, 32], strides = [1, 1]} : vector<8x128xf32> to vector<8x32xf32>
    %45 = vector.extract_strided_slice %41 {offsets = [0, 96], sizes = [8, 32], strides = [1, 1]} : vector<8x128xf32> to vector<8x32xf32>
    %46 = arith.mulf %43, %31 : vector<8x32xf32>
    %47 = arith.mulf %42, %44 : vector<8x32xf32>
    %48 = arith.addf %46, %47 : vector<8x32xf32>
    %49 = math.tanh %48 : vector<8x32xf32>
    %50 = arith.mulf %45, %49 : vector<8x32xf32>
    %51 = arith.truncf %50 : vector<8x32xf32> to vector<8x32xbf16>
    %cst_31 = arith.constant dense<0.000000e+00> : vector<8x128xf32>
    %52 = tpu.matmul %34, %15, %cst_31 {dimension_numbers = #tpu.dot_dimension_numbers<[1], [0], [0], [1], [0, 0, 1, 1], [], []>} : vector<8x32xbf16>, vector<32x128xbf16>, vector<8x128xf32> -> vector<8x128xf32>
    %cst_32 = arith.constant dense<0.000000e+00> : vector<8x128xf32>
    %53 = tpu.matmul %51, %13, %cst_32 {dimension_numbers = #tpu.dot_dimension_numbers<[1], [0], [0], [1], [0, 0, 1, 1], [], []>} : vector<8x32xbf16>, vector<32x128xbf16>, vector<8x128xf32> -> vector<8x128xf32>
    %54 = arith.addf %53, %19 : vector<8x128xf32>
    %55 = arith.addf %54, %52 : vector<8x128xf32>
    %56 = arith.mulf %55, %8 : vector<8x128xf32>
    %57 = math.tanh %56 : vector<8x128xf32>
    %58 = arith.mulf %57, %8 : vector<8x128xf32>
    %59 = arith.addf %58, %11 : vector<8x128xf32>
    %60 = vector.extract_strided_slice %59 {offsets = [0, 0], sizes = [8, 32], strides = [1, 1]} : vector<8x128xf32> to vector<8x32xf32>
    %61 = vector.extract_strided_slice %59 {offsets = [0, 32], sizes = [8, 32], strides = [1, 1]} : vector<8x128xf32> to vector<8x32xf32>
    %62 = vector.extract_strided_slice %59 {offsets = [0, 64], sizes = [8, 32], strides = [1, 1]} : vector<8x128xf32> to vector<8x32xf32>
    %63 = vector.extract_strided_slice %59 {offsets = [0, 96], sizes = [8, 32], strides = [1, 1]} : vector<8x128xf32> to vector<8x32xf32>
    %64 = arith.mulf %61, %32 : vector<8x32xf32>
    %65 = arith.mulf %60, %62 : vector<8x32xf32>
    %66 = arith.addf %64, %65 : vector<8x32xf32>
    %67 = math.tanh %66 : vector<8x32xf32>
    %68 = arith.mulf %63, %67 : vector<8x32xf32>
    %69 = arith.truncf %68 : vector<8x32xf32> to vector<8x32xbf16>
    %cst_33 = arith.constant dense<0.000000e+00> : vector<8x128xf32>
    %70 = tpu.matmul %69, %20, %cst_33 {dimension_numbers = #tpu.dot_dimension_numbers<[1], [0], [0], [1], [0, 0, 1, 1], [], []>} : vector<8x32xbf16>, vector<32x128xbf16>, vector<8x128xf32> -> vector<8x128xf32>
    %71 = vector.extract_strided_slice %30 {offsets = [0, 0], sizes = [8, 128], strides = [1, 1]} : vector<56x128xf32> to vector<8x128xf32>
    %72 = arith.addf %70, %71 : vector<8x128xf32>
    %cst_34 = arith.constant 5.000000e-01 : f32
    %73 = vector.broadcast %cst_34 : f32 to vector<8x128xf32>
    %74 = arith.mulf %73, %72 : vector<8x128xf32>
    %75 = math.tanh %74 : vector<8x128xf32>
    %cst_35 = arith.constant 5.000000e-01 : f32
    %76 = vector.broadcast %cst_35 : f32 to vector<8x128xf32>
    %77 = arith.mulf %76, %75 : vector<8x128xf32>
    %cst_36 = arith.constant 5.000000e-01 : f32
    %78 = vector.broadcast %cst_36 : f32 to vector<8x128xf32>
    %79 = arith.addf %77, %78 : vector<8x128xf32>
    %c0_37 = arith.constant 0 : index
    %c0_38 = arith.constant 0 : index
    %80 = vector.load %arg11[%c0_37, %c0_38] : memref<56x128xf32, #tpu.memory_space<vmem>>, vector<8x128xf32>
    tpu.vector_store %arg11[%c0_37, %c0_38], %79 {strides = array<i32>} : memref<56x128xf32, #tpu.memory_space<vmem>>, vector<8x128xf32>,
    %cst_39 = arith.constant dense<0.000000e+00> : vector<8x128xf32>
    %81 = tpu.matmul %51, %14, %cst_39 {dimension_numbers = #tpu.dot_dimension_numbers<[1], [0], [0], [1], [0, 0, 1, 1], [], []>} : vector<8x32xbf16>, vector<32x128xbf16>, vector<8x128xf32> -> vector<8x128xf32>
    %82 = vector.extract_strided_slice %24 {offsets = [8, 0], sizes = [8, 128], strides = [1, 1]} : vector<56x128xf32> to vector<8x128xf32>
    %83 = arith.addf %82, %81 : vector<8x128xf32>
    %84 = arith.mulf %83, %8 : vector<8x128xf32>
    %85 = math.tanh %84 : vector<8x128xf32>
    %86 = arith.mulf %85, %8 : vector<8x128xf32>
    %87 = arith.addf %86, %11 : vector<8x128xf32>
    %88 = vector.extract_strided_slice %87 {offsets = [0, 0], sizes = [8, 32], strides = [1, 1]} : vector<8x128xf32> to vector<8x32xf32>
    %89 = vector.extract_strided_slice %87 {offsets = [0, 32], sizes = [8, 32], strides = [1, 1]} : vector<8x128xf32> to vector<8x32xf32>
    %90 = vector.extract_strided_slice %87 {offsets = [0, 64], sizes = [8, 32], strides = [1, 1]} : vector<8x128xf32> to vector<8x32xf32>
    %91 = vector.extract_strided_slice %87 {offsets = [0, 96], sizes = [8, 32], strides = [1, 1]} : vector<8x128xf32> to vector<8x32xf32>
    %92 = arith.mulf %89, %48 : vector<8x32xf32>
    %93 = arith.mulf %88, %90 : vector<8x32xf32>
    %94 = arith.addf %92, %93 : vector<8x32xf32>
    %95 = math.tanh %94 : vector<8x32xf32>
    %96 = arith.mulf %91, %95 : vector<8x32xf32>
    %97 = arith.truncf %96 : vector<8x32xf32> to vector<8x32xbf16>
    %cst_40 = arith.constant dense<0.000000e+00> : vector<8x128xf32>
    %98 = tpu.matmul %69, %15, %cst_40 {dimension_numbers = #tpu.dot_dimension_numbers<[1], [0], [0], [1], [0, 0, 1, 1], [], []>} : vector<8x32xbf16>, vector<32x128xbf16>, vector<8x128xf32> -> vector<8x128xf32>
    %cst_41 = arith.constant dense<0.000000e+00> : vector<8x128xf32>
    %99 = tpu.matmul %97, %13, %cst_41 {dimension_numbers = #tpu.dot_dimension_numbers<[1], [0], [0], [1], [0, 0, 1, 1], [], []>} : vector<8x32xbf16>, vector<32x128xbf16>, vector<8x128xf32> -> vector<8x128xf32>
    %100 = arith.addf %99, %19 : vector<8x128xf32>
    %101 = arith.addf %100, %98 : vector<8x128xf32>
    %102 = arith.mulf %101, %8 : vector<8x128xf32>
    %103 = math.tanh %102 : vector<8x128xf32>
    %104 = arith.mulf %103, %8 : vector<8x128xf32>
    %105 = arith.addf %104, %11 : vector<8x128xf32>
    %106 = vector.extract_strided_slice %105 {offsets = [0, 0], sizes = [8, 32], strides = [1, 1]} : vector<8x128xf32> to vector<8x32xf32>
    %107 = vector.extract_strided_slice %105 {offsets = [0, 32], sizes = [8, 32], strides = [1, 1]} : vector<8x128xf32> to vector<8x32xf32>
    %108 = vector.extract_strided_slice %105 {offsets = [0, 64], sizes = [8, 32], strides = [1, 1]} : vector<8x128xf32> to vector<8x32xf32>
    %109 = vector.extract_strided_slice %105 {offsets = [0, 96], sizes = [8, 32], strides = [1, 1]} : vector<8x128xf32> to vector<8x32xf32>
    %110 = arith.mulf %107, %66 : vector<8x32xf32>
    %111 = arith.mulf %106, %108 : vector<8x32xf32>
    %112 = arith.addf %110, %111 : vector<8x32xf32>
    %113 = math.tanh %112 : vector<8x32xf32>
    %114 = arith.mulf %109, %113 : vector<8x32xf32>
    %115 = arith.truncf %114 : vector<8x32xf32> to vector<8x32xbf16>
    %cst_42 = arith.constant dense<0.000000e+00> : vector<8x128xf32>
    %116 = tpu.matmul %115, %20, %cst_42 {dimension_numbers = #tpu.dot_dimension_numbers<[1], [0], [0], [1], [0, 0, 1, 1], [], []>} : vector<8x32xbf16>, vector<32x128xbf16>, vector<8x128xf32> -> vector<8x128xf32>
    %117 = vector.extract_strided_slice %30 {offsets = [8, 0], sizes = [8, 128], strides = [1, 1]} : vector<56x128xf32> to vector<8x128xf32>
    %118 = arith.addf %116, %117 : vector<8x128xf32>
    %cst_43 = arith.constant 5.000000e-01 : f32
    %119 = vector.broadcast %cst_43 : f32 to vector<8x128xf32>
    %120 = arith.mulf %119, %118 : vector<8x128xf32>
    %121 = math.tanh %120 : vector<8x128xf32>
    %cst_44 = arith.constant 5.000000e-01 : f32
    %122 = vector.broadcast %cst_44 : f32 to vector<8x128xf32>
    %123 = arith.mulf %122, %121 : vector<8x128xf32>
    %cst_45 = arith.constant 5.000000e-01 : f32
    %124 = vector.broadcast %cst_45 : f32 to vector<8x128xf32>
    %125 = arith.addf %123, %124 : vector<8x128xf32>
    %c8 = arith.constant 8 : index
    %c0_46 = arith.constant 0 : index
    %126 = vector.load %arg11[%c8, %c0_46] : memref<56x128xf32, #tpu.memory_space<vmem>>, vector<8x128xf32>
    tpu.vector_store %arg11[%c8, %c0_46], %125 {strides = array<i32>} : memref<56x128xf32, #tpu.memory_space<vmem>>, vector<8x128xf32>,
    %cst_47 = arith.constant dense<0.000000e+00> : vector<8x128xf32>
    %127 = tpu.matmul %97, %14, %cst_47 {dimension_numbers = #tpu.dot_dimension_numbers<[1], [0], [0], [1], [0, 0, 1, 1], [], []>} : vector<8x32xbf16>, vector<32x128xbf16>, vector<8x128xf32> -> vector<8x128xf32>
    %128 = vector.extract_strided_slice %24 {offsets = [16, 0], sizes = [8, 128], strides = [1, 1]} : vector<56x128xf32> to vector<8x128xf32>
    %129 = arith.addf %128, %127 : vector<8x128xf32>
    %130 = arith.mulf %129, %8 : vector<8x128xf32>
    %131 = math.tanh %130 : vector<8x128xf32>
    %132 = arith.mulf %131, %8 : vector<8x128xf32>
    %133 = arith.addf %132, %11 : vector<8x128xf32>
    %134 = vector.extract_strided_slice %133 {offsets = [0, 0], sizes = [8, 32], strides = [1, 1]} : vector<8x128xf32> to vector<8x32xf32>
    %135 = vector.extract_strided_slice %133 {offsets = [0, 32], sizes = [8, 32], strides = [1, 1]} : vector<8x128xf32> to vector<8x32xf32>
    %136 = vector.extract_strided_slice %133 {offsets = [0, 64], sizes = [8, 32], strides = [1, 1]} : vector<8x128xf32> to vector<8x32xf32>
    %137 = vector.extract_strided_slice %133 {offsets = [0, 96], sizes = [8, 32], strides = [1, 1]} : vector<8x128xf32> to vector<8x32xf32>
    %138 = arith.mulf %135, %94 : vector<8x32xf32>
    %139 = arith.mulf %134, %136 : vector<8x32xf32>
    %140 = arith.addf %138, %139 : vector<8x32xf32>
    %141 = math.tanh %140 : vector<8x32xf32>
    %142 = arith.mulf %137, %141 : vector<8x32xf32>
    %143 = arith.truncf %142 : vector<8x32xf32> to vector<8x32xbf16>
    %cst_48 = arith.constant dense<0.000000e+00> : vector<8x128xf32>
    %144 = tpu.matmul %115, %15, %cst_48 {dimension_numbers = #tpu.dot_dimension_numbers<[1], [0], [0], [1], [0, 0, 1, 1], [], []>} : vector<8x32xbf16>, vector<32x128xbf16>, vector<8x128xf32> -> vector<8x128xf32>
    %cst_49 = arith.constant dense<0.000000e+00> : vector<8x128xf32>
    %145 = tpu.matmul %143, %13, %cst_49 {dimension_numbers = #tpu.dot_dimension_numbers<[1], [0], [0], [1], [0, 0, 1, 1], [], []>} : vector<8x32xbf16>, vector<32x128xbf16>, vector<8x128xf32> -> vector<8x128xf32>
    %146 = arith.addf %145, %19 : vector<8x128xf32>
    %147 = arith.addf %146, %144 : vector<8x128xf32>
    %148 = arith.mulf %147, %8 : vector<8x128xf32>
    %149 = math.tanh %148 : vector<8x128xf32>
    %150 = arith.mulf %149, %8 : vector<8x128xf32>
    %151 = arith.addf %150, %11 : vector<8x128xf32>
    %152 = vector.extract_strided_slice %151 {offsets = [0, 0], sizes = [8, 32], strides = [1, 1]} : vector<8x128xf32> to vector<8x32xf32>
    %153 = vector.extract_strided_slice %151 {offsets = [0, 32], sizes = [8, 32], strides = [1, 1]} : vector<8x128xf32> to vector<8x32xf32>
    %154 = vector.extract_strided_slice %151 {offsets = [0, 64], sizes = [8, 32], strides = [1, 1]} : vector<8x128xf32> to vector<8x32xf32>
    %155 = vector.extract_strided_slice %151 {offsets = [0, 96], sizes = [8, 32], strides = [1, 1]} : vector<8x128xf32> to vector<8x32xf32>
    %156 = arith.mulf %153, %112 : vector<8x32xf32>
    %157 = arith.mulf %152, %154 : vector<8x32xf32>
    %158 = arith.addf %156, %157 : vector<8x32xf32>
    %159 = math.tanh %158 : vector<8x32xf32>
    %160 = arith.mulf %155, %159 : vector<8x32xf32>
    %161 = arith.truncf %160 : vector<8x32xf32> to vector<8x32xbf16>
    %cst_50 = arith.constant dense<0.000000e+00> : vector<8x128xf32>
    %162 = tpu.matmul %161, %20, %cst_50 {dimension_numbers = #tpu.dot_dimension_numbers<[1], [0], [0], [1], [0, 0, 1, 1], [], []>} : vector<8x32xbf16>, vector<32x128xbf16>, vector<8x128xf32> -> vector<8x128xf32>
    %163 = vector.extract_strided_slice %30 {offsets = [16, 0], sizes = [8, 128], strides = [1, 1]} : vector<56x128xf32> to vector<8x128xf32>
    %164 = arith.addf %162, %163 : vector<8x128xf32>
    %cst_51 = arith.constant 5.000000e-01 : f32
    %165 = vector.broadcast %cst_51 : f32 to vector<8x128xf32>
    %166 = arith.mulf %165, %164 : vector<8x128xf32>
    %167 = math.tanh %166 : vector<8x128xf32>
    %cst_52 = arith.constant 5.000000e-01 : f32
    %168 = vector.broadcast %cst_52 : f32 to vector<8x128xf32>
    %169 = arith.mulf %168, %167 : vector<8x128xf32>
    %cst_53 = arith.constant 5.000000e-01 : f32
    %170 = vector.broadcast %cst_53 : f32 to vector<8x128xf32>
    %171 = arith.addf %169, %170 : vector<8x128xf32>
    %c16 = arith.constant 16 : index
    %c0_54 = arith.constant 0 : index
    %172 = vector.load %arg11[%c16, %c0_54] : memref<56x128xf32, #tpu.memory_space<vmem>>, vector<8x128xf32>
    tpu.vector_store %arg11[%c16, %c0_54], %171 {strides = array<i32>} : memref<56x128xf32, #tpu.memory_space<vmem>>, vector<8x128xf32>,
    %cst_55 = arith.constant dense<0.000000e+00> : vector<8x128xf32>
    %173 = tpu.matmul %143, %14, %cst_55 {dimension_numbers = #tpu.dot_dimension_numbers<[1], [0], [0], [1], [0, 0, 1, 1], [], []>} : vector<8x32xbf16>, vector<32x128xbf16>, vector<8x128xf32> -> vector<8x128xf32>
    %174 = vector.extract_strided_slice %24 {offsets = [24, 0], sizes = [8, 128], strides = [1, 1]} : vector<56x128xf32> to vector<8x128xf32>
    %175 = arith.addf %174, %173 : vector<8x128xf32>
    %176 = arith.mulf %175, %8 : vector<8x128xf32>
    %177 = math.tanh %176 : vector<8x128xf32>
    %178 = arith.mulf %177, %8 : vector<8x128xf32>
    %179 = arith.addf %178, %11 : vector<8x128xf32>
    %180 = vector.extract_strided_slice %179 {offsets = [0, 0], sizes = [8, 32], strides = [1, 1]} : vector<8x128xf32> to vector<8x32xf32>
    %181 = vector.extract_strided_slice %179 {offsets = [0, 32], sizes = [8, 32], strides = [1, 1]} : vector<8x128xf32> to vector<8x32xf32>
    %182 = vector.extract_strided_slice %179 {offsets = [0, 64], sizes = [8, 32], strides = [1, 1]} : vector<8x128xf32> to vector<8x32xf32>
    %183 = vector.extract_strided_slice %179 {offsets = [0, 96], sizes = [8, 32], strides = [1, 1]} : vector<8x128xf32> to vector<8x32xf32>
    %184 = arith.mulf %181, %140 : vector<8x32xf32>
    %185 = arith.mulf %180, %182 : vector<8x32xf32>
    %186 = arith.addf %184, %185 : vector<8x32xf32>
    %187 = math.tanh %186 : vector<8x32xf32>
    %188 = arith.mulf %183, %187 : vector<8x32xf32>
    %189 = arith.truncf %188 : vector<8x32xf32> to vector<8x32xbf16>
    %cst_56 = arith.constant dense<0.000000e+00> : vector<8x128xf32>
    %190 = tpu.matmul %161, %15, %cst_56 {dimension_numbers = #tpu.dot_dimension_numbers<[1], [0], [0], [1], [0, 0, 1, 1], [], []>} : vector<8x32xbf16>, vector<32x128xbf16>, vector<8x128xf32> -> vector<8x128xf32>
    %cst_57 = arith.constant dense<0.000000e+00> : vector<8x128xf32>
    %191 = tpu.matmul %189, %13, %cst_57 {dimension_numbers = #tpu.dot_dimension_numbers<[1], [0], [0], [1], [0, 0, 1, 1], [], []>} : vector<8x32xbf16>, vector<32x128xbf16>, vector<8x128xf32> -> vector<8x128xf32>
    %192 = arith.addf %191, %19 : vector<8x128xf32>
    %193 = arith.addf %192, %190 : vector<8x128xf32>
    %194 = arith.mulf %193, %8 : vector<8x128xf32>
    %195 = math.tanh %194 : vector<8x128xf32>
    %196 = arith.mulf %195, %8 : vector<8x128xf32>
    %197 = arith.addf %196, %11 : vector<8x128xf32>
    %198 = vector.extract_strided_slice %197 {offsets = [0, 0], sizes = [8, 32], strides = [1, 1]} : vector<8x128xf32> to vector<8x32xf32>
    %199 = vector.extract_strided_slice %197 {offsets = [0, 32], sizes = [8, 32], strides = [1, 1]} : vector<8x128xf32> to vector<8x32xf32>
    %200 = vector.extract_strided_slice %197 {offsets = [0, 64], sizes = [8, 32], strides = [1, 1]} : vector<8x128xf32> to vector<8x32xf32>
    %201 = vector.extract_strided_slice %197 {offsets = [0, 96], sizes = [8, 32], strides = [1, 1]} : vector<8x128xf32> to vector<8x32xf32>
    %202 = arith.mulf %199, %158 : vector<8x32xf32>
    %203 = arith.mulf %198, %200 : vector<8x32xf32>
    %204 = arith.addf %202, %203 : vector<8x32xf32>
    %205 = math.tanh %204 : vector<8x32xf32>
    %206 = arith.mulf %201, %205 : vector<8x32xf32>
    %207 = arith.truncf %206 : vector<8x32xf32> to vector<8x32xbf16>
    %cst_58 = arith.constant dense<0.000000e+00> : vector<8x128xf32>
    %208 = tpu.matmul %207, %20, %cst_58 {dimension_numbers = #tpu.dot_dimension_numbers<[1], [0], [0], [1], [0, 0, 1, 1], [], []>} : vector<8x32xbf16>, vector<32x128xbf16>, vector<8x128xf32> -> vector<8x128xf32>
    %209 = vector.extract_strided_slice %30 {offsets = [24, 0], sizes = [8, 128], strides = [1, 1]} : vector<56x128xf32> to vector<8x128xf32>
    %210 = arith.addf %208, %209 : vector<8x128xf32>
    %cst_59 = arith.constant 5.000000e-01 : f32
    %211 = vector.broadcast %cst_59 : f32 to vector<8x128xf32>
    %212 = arith.mulf %211, %210 : vector<8x128xf32>
    %213 = math.tanh %212 : vector<8x128xf32>
    %cst_60 = arith.constant 5.000000e-01 : f32
    %214 = vector.broadcast %cst_60 : f32 to vector<8x128xf32>
    %215 = arith.mulf %214, %213 : vector<8x128xf32>
    %cst_61 = arith.constant 5.000000e-01 : f32
    %216 = vector.broadcast %cst_61 : f32 to vector<8x128xf32>
    %217 = arith.addf %215, %216 : vector<8x128xf32>
    %c24 = arith.constant 24 : index
    %c0_62 = arith.constant 0 : index
    %218 = vector.load %arg11[%c24, %c0_62] : memref<56x128xf32, #tpu.memory_space<vmem>>, vector<8x128xf32>
    tpu.vector_store %arg11[%c24, %c0_62], %217 {strides = array<i32>} : memref<56x128xf32, #tpu.memory_space<vmem>>, vector<8x128xf32>,
    %cst_63 = arith.constant dense<0.000000e+00> : vector<8x128xf32>
    %219 = tpu.matmul %189, %14, %cst_63 {dimension_numbers = #tpu.dot_dimension_numbers<[1], [0], [0], [1], [0, 0, 1, 1], [], []>} : vector<8x32xbf16>, vector<32x128xbf16>, vector<8x128xf32> -> vector<8x128xf32>
    %220 = vector.extract_strided_slice %24 {offsets = [32, 0], sizes = [8, 128], strides = [1, 1]} : vector<56x128xf32> to vector<8x128xf32>
    %221 = arith.addf %220, %219 : vector<8x128xf32>
    %222 = arith.mulf %221, %8 : vector<8x128xf32>
    %223 = math.tanh %222 : vector<8x128xf32>
    %224 = arith.mulf %223, %8 : vector<8x128xf32>
    %225 = arith.addf %224, %11 : vector<8x128xf32>
    %226 = vector.extract_strided_slice %225 {offsets = [0, 0], sizes = [8, 32], strides = [1, 1]} : vector<8x128xf32> to vector<8x32xf32>
    %227 = vector.extract_strided_slice %225 {offsets = [0, 32], sizes = [8, 32], strides = [1, 1]} : vector<8x128xf32> to vector<8x32xf32>
    %228 = vector.extract_strided_slice %225 {offsets = [0, 64], sizes = [8, 32], strides = [1, 1]} : vector<8x128xf32> to vector<8x32xf32>
    %229 = vector.extract_strided_slice %225 {offsets = [0, 96], sizes = [8, 32], strides = [1, 1]} : vector<8x128xf32> to vector<8x32xf32>
    %230 = arith.mulf %227, %186 : vector<8x32xf32>
    %231 = arith.mulf %226, %228 : vector<8x32xf32>
    %232 = arith.addf %230, %231 : vector<8x32xf32>
    %233 = math.tanh %232 : vector<8x32xf32>
    %234 = arith.mulf %229, %233 : vector<8x32xf32>
    %235 = arith.truncf %234 : vector<8x32xf32> to vector<8x32xbf16>
    %cst_64 = arith.constant dense<0.000000e+00> : vector<8x128xf32>
    %236 = tpu.matmul %207, %15, %cst_64 {dimension_numbers = #tpu.dot_dimension_numbers<[1], [0], [0], [1], [0, 0, 1, 1], [], []>} : vector<8x32xbf16>, vector<32x128xbf16>, vector<8x128xf32> -> vector<8x128xf32>
    %cst_65 = arith.constant dense<0.000000e+00> : vector<8x128xf32>
    %237 = tpu.matmul %235, %13, %cst_65 {dimension_numbers = #tpu.dot_dimension_numbers<[1], [0], [0], [1], [0, 0, 1, 1], [], []>} : vector<8x32xbf16>, vector<32x128xbf16>, vector<8x128xf32> -> vector<8x128xf32>
    %238 = arith.addf %237, %19 : vector<8x128xf32>
    %239 = arith.addf %238, %236 : vector<8x128xf32>
    %240 = arith.mulf %239, %8 : vector<8x128xf32>
    %241 = math.tanh %240 : vector<8x128xf32>
    %242 = arith.mulf %241, %8 : vector<8x128xf32>
    %243 = arith.addf %242, %11 : vector<8x128xf32>
    %244 = vector.extract_strided_slice %243 {offsets = [0, 0], sizes = [8, 32], strides = [1, 1]} : vector<8x128xf32> to vector<8x32xf32>
    %245 = vector.extract_strided_slice %243 {offsets = [0, 32], sizes = [8, 32], strides = [1, 1]} : vector<8x128xf32> to vector<8x32xf32>
    %246 = vector.extract_strided_slice %243 {offsets = [0, 64], sizes = [8, 32], strides = [1, 1]} : vector<8x128xf32> to vector<8x32xf32>
    %247 = vector.extract_strided_slice %243 {offsets = [0, 96], sizes = [8, 32], strides = [1, 1]} : vector<8x128xf32> to vector<8x32xf32>
    %248 = arith.mulf %245, %204 : vector<8x32xf32>
    %249 = arith.mulf %244, %246 : vector<8x32xf32>
    %250 = arith.addf %248, %249 : vector<8x32xf32>
    %251 = math.tanh %250 : vector<8x32xf32>
    %252 = arith.mulf %247, %251 : vector<8x32xf32>
    %253 = arith.truncf %252 : vector<8x32xf32> to vector<8x32xbf16>
    %cst_66 = arith.constant dense<0.000000e+00> : vector<8x128xf32>
    %254 = tpu.matmul %253, %20, %cst_66 {dimension_numbers = #tpu.dot_dimension_numbers<[1], [0], [0], [1], [0, 0, 1, 1], [], []>} : vector<8x32xbf16>, vector<32x128xbf16>, vector<8x128xf32> -> vector<8x128xf32>
    %255 = vector.extract_strided_slice %30 {offsets = [32, 0], sizes = [8, 128], strides = [1, 1]} : vector<56x128xf32> to vector<8x128xf32>
    %256 = arith.addf %254, %255 : vector<8x128xf32>
    %cst_67 = arith.constant 5.000000e-01 : f32
    %257 = vector.broadcast %cst_67 : f32 to vector<8x128xf32>
    %258 = arith.mulf %257, %256 : vector<8x128xf32>
    %259 = math.tanh %258 : vector<8x128xf32>
    %cst_68 = arith.constant 5.000000e-01 : f32
    %260 = vector.broadcast %cst_68 : f32 to vector<8x128xf32>
    %261 = arith.mulf %260, %259 : vector<8x128xf32>
    %cst_69 = arith.constant 5.000000e-01 : f32
    %262 = vector.broadcast %cst_69 : f32 to vector<8x128xf32>
    %263 = arith.addf %261, %262 : vector<8x128xf32>
    %c32 = arith.constant 32 : index
    %c0_70 = arith.constant 0 : index
    %264 = vector.load %arg11[%c32, %c0_70] : memref<56x128xf32, #tpu.memory_space<vmem>>, vector<8x128xf32>
    tpu.vector_store %arg11[%c32, %c0_70], %263 {strides = array<i32>} : memref<56x128xf32, #tpu.memory_space<vmem>>, vector<8x128xf32>,
    %cst_71 = arith.constant dense<0.000000e+00> : vector<8x128xf32>
    %265 = tpu.matmul %235, %14, %cst_71 {dimension_numbers = #tpu.dot_dimension_numbers<[1], [0], [0], [1], [0, 0, 1, 1], [], []>} : vector<8x32xbf16>, vector<32x128xbf16>, vector<8x128xf32> -> vector<8x128xf32>
    %266 = vector.extract_strided_slice %24 {offsets = [40, 0], sizes = [8, 128], strides = [1, 1]} : vector<56x128xf32> to vector<8x128xf32>
    %267 = arith.addf %266, %265 : vector<8x128xf32>
    %268 = arith.mulf %267, %8 : vector<8x128xf32>
    %269 = math.tanh %268 : vector<8x128xf32>
    %270 = arith.mulf %269, %8 : vector<8x128xf32>
    %271 = arith.addf %270, %11 : vector<8x128xf32>
    %272 = vector.extract_strided_slice %271 {offsets = [0, 0], sizes = [8, 32], strides = [1, 1]} : vector<8x128xf32> to vector<8x32xf32>
    %273 = vector.extract_strided_slice %271 {offsets = [0, 32], sizes = [8, 32], strides = [1, 1]} : vector<8x128xf32> to vector<8x32xf32>
    %274 = vector.extract_strided_slice %271 {offsets = [0, 64], sizes = [8, 32], strides = [1, 1]} : vector<8x128xf32> to vector<8x32xf32>
    %275 = vector.extract_strided_slice %271 {offsets = [0, 96], sizes = [8, 32], strides = [1, 1]} : vector<8x128xf32> to vector<8x32xf32>
    %276 = arith.mulf %273, %232 : vector<8x32xf32>
    %277 = arith.mulf %272, %274 : vector<8x32xf32>
    %278 = arith.addf %276, %277 : vector<8x32xf32>
    %279 = math.tanh %278 : vector<8x32xf32>
    %280 = arith.mulf %275, %279 : vector<8x32xf32>
    %281 = arith.truncf %280 : vector<8x32xf32> to vector<8x32xbf16>
    %cst_72 = arith.constant dense<0.000000e+00> : vector<8x128xf32>
    %282 = tpu.matmul %253, %15, %cst_72 {dimension_numbers = #tpu.dot_dimension_numbers<[1], [0], [0], [1], [0, 0, 1, 1], [], []>} : vector<8x32xbf16>, vector<32x128xbf16>, vector<8x128xf32> -> vector<8x128xf32>
    %cst_73 = arith.constant dense<0.000000e+00> : vector<8x128xf32>
    %283 = tpu.matmul %281, %13, %cst_73 {dimension_numbers = #tpu.dot_dimension_numbers<[1], [0], [0], [1], [0, 0, 1, 1], [], []>} : vector<8x32xbf16>, vector<32x128xbf16>, vector<8x128xf32> -> vector<8x128xf32>
    %284 = arith.addf %283, %19 : vector<8x128xf32>
    %285 = arith.addf %284, %282 : vector<8x128xf32>
    %286 = arith.mulf %285, %8 : vector<8x128xf32>
    %287 = math.tanh %286 : vector<8x128xf32>
    %288 = arith.mulf %287, %8 : vector<8x128xf32>
    %289 = arith.addf %288, %11 : vector<8x128xf32>
    %290 = vector.extract_strided_slice %289 {offsets = [0, 0], sizes = [8, 32], strides = [1, 1]} : vector<8x128xf32> to vector<8x32xf32>
    %291 = vector.extract_strided_slice %289 {offsets = [0, 32], sizes = [8, 32], strides = [1, 1]} : vector<8x128xf32> to vector<8x32xf32>
    %292 = vector.extract_strided_slice %289 {offsets = [0, 64], sizes = [8, 32], strides = [1, 1]} : vector<8x128xf32> to vector<8x32xf32>
    %293 = vector.extract_strided_slice %289 {offsets = [0, 96], sizes = [8, 32], strides = [1, 1]} : vector<8x128xf32> to vector<8x32xf32>
    %294 = arith.mulf %291, %250 : vector<8x32xf32>
    %295 = arith.mulf %290, %292 : vector<8x32xf32>
    %296 = arith.addf %294, %295 : vector<8x32xf32>
    %297 = math.tanh %296 : vector<8x32xf32>
    %298 = arith.mulf %293, %297 : vector<8x32xf32>
    %299 = arith.truncf %298 : vector<8x32xf32> to vector<8x32xbf16>
    %cst_74 = arith.constant dense<0.000000e+00> : vector<8x128xf32>
    %300 = tpu.matmul %299, %20, %cst_74 {dimension_numbers = #tpu.dot_dimension_numbers<[1], [0], [0], [1], [0, 0, 1, 1], [], []>} : vector<8x32xbf16>, vector<32x128xbf16>, vector<8x128xf32> -> vector<8x128xf32>
    %301 = vector.extract_strided_slice %30 {offsets = [40, 0], sizes = [8, 128], strides = [1, 1]} : vector<56x128xf32> to vector<8x128xf32>
    %302 = arith.addf %300, %301 : vector<8x128xf32>
    %cst_75 = arith.constant 5.000000e-01 : f32
    %303 = vector.broadcast %cst_75 : f32 to vector<8x128xf32>
    %304 = arith.mulf %303, %302 : vector<8x128xf32>
    %305 = math.tanh %304 : vector<8x128xf32>
    %cst_76 = arith.constant 5.000000e-01 : f32
    %306 = vector.broadcast %cst_76 : f32 to vector<8x128xf32>
    %307 = arith.mulf %306, %305 : vector<8x128xf32>
    %cst_77 = arith.constant 5.000000e-01 : f32
    %308 = vector.broadcast %cst_77 : f32 to vector<8x128xf32>
    %309 = arith.addf %307, %308 : vector<8x128xf32>
    %c40 = arith.constant 40 : index
    %c0_78 = arith.constant 0 : index
    %310 = vector.load %arg11[%c40, %c0_78] : memref<56x128xf32, #tpu.memory_space<vmem>>, vector<8x128xf32>
    tpu.vector_store %arg11[%c40, %c0_78], %309 {strides = array<i32>} : memref<56x128xf32, #tpu.memory_space<vmem>>, vector<8x128xf32>,
    %cst_79 = arith.constant dense<0.000000e+00> : vector<8x128xf32>
    %311 = tpu.matmul %281, %14, %cst_79 {dimension_numbers = #tpu.dot_dimension_numbers<[1], [0], [0], [1], [0, 0, 1, 1], [], []>} : vector<8x32xbf16>, vector<32x128xbf16>, vector<8x128xf32> -> vector<8x128xf32>
    %312 = vector.extract_strided_slice %24 {offsets = [48, 0], sizes = [8, 128], strides = [1, 1]} : vector<56x128xf32> to vector<8x128xf32>
    %313 = arith.addf %312, %311 : vector<8x128xf32>
    %314 = arith.mulf %313, %8 : vector<8x128xf32>
    %315 = math.tanh %314 : vector<8x128xf32>
    %316 = arith.mulf %315, %8 : vector<8x128xf32>
    %317 = arith.addf %316, %11 : vector<8x128xf32>
    %318 = vector.extract_strided_slice %317 {offsets = [0, 0], sizes = [8, 32], strides = [1, 1]} : vector<8x128xf32> to vector<8x32xf32>
    %319 = vector.extract_strided_slice %317 {offsets = [0, 32], sizes = [8, 32], strides = [1, 1]} : vector<8x128xf32> to vector<8x32xf32>
    %320 = vector.extract_strided_slice %317 {offsets = [0, 64], sizes = [8, 32], strides = [1, 1]} : vector<8x128xf32> to vector<8x32xf32>
    %321 = vector.extract_strided_slice %317 {offsets = [0, 96], sizes = [8, 32], strides = [1, 1]} : vector<8x128xf32> to vector<8x32xf32>
    %322 = arith.mulf %319, %278 : vector<8x32xf32>
    %323 = arith.mulf %318, %320 : vector<8x32xf32>
    %324 = arith.addf %322, %323 : vector<8x32xf32>
    %325 = math.tanh %324 : vector<8x32xf32>
    %326 = arith.mulf %321, %325 : vector<8x32xf32>
    %327 = arith.truncf %326 : vector<8x32xf32> to vector<8x32xbf16>
    %cst_80 = arith.constant dense<0.000000e+00> : vector<8x128xf32>
    %328 = tpu.matmul %299, %15, %cst_80 {dimension_numbers = #tpu.dot_dimension_numbers<[1], [0], [0], [1], [0, 0, 1, 1], [], []>} : vector<8x32xbf16>, vector<32x128xbf16>, vector<8x128xf32> -> vector<8x128xf32>
    %cst_81 = arith.constant dense<0.000000e+00> : vector<8x128xf32>
    %329 = tpu.matmul %327, %13, %cst_81 {dimension_numbers = #tpu.dot_dimension_numbers<[1], [0], [0], [1], [0, 0, 1, 1], [], []>} : vector<8x32xbf16>, vector<32x128xbf16>, vector<8x128xf32> -> vector<8x128xf32>
    %330 = arith.addf %329, %19 : vector<8x128xf32>
    %331 = arith.addf %330, %328 : vector<8x128xf32>
    %332 = arith.mulf %331, %8 : vector<8x128xf32>
    %333 = math.tanh %332 : vector<8x128xf32>
    %334 = arith.mulf %333, %8 : vector<8x128xf32>
    %335 = arith.addf %334, %11 : vector<8x128xf32>
    %336 = vector.extract_strided_slice %335 {offsets = [0, 0], sizes = [8, 32], strides = [1, 1]} : vector<8x128xf32> to vector<8x32xf32>
    %337 = vector.extract_strided_slice %335 {offsets = [0, 32], sizes = [8, 32], strides = [1, 1]} : vector<8x128xf32> to vector<8x32xf32>
    %338 = vector.extract_strided_slice %335 {offsets = [0, 64], sizes = [8, 32], strides = [1, 1]} : vector<8x128xf32> to vector<8x32xf32>
    %339 = vector.extract_strided_slice %335 {offsets = [0, 96], sizes = [8, 32], strides = [1, 1]} : vector<8x128xf32> to vector<8x32xf32>
    %340 = arith.mulf %337, %296 : vector<8x32xf32>
    %341 = arith.mulf %336, %338 : vector<8x32xf32>
    %342 = arith.addf %340, %341 : vector<8x32xf32>
    %343 = math.tanh %342 : vector<8x32xf32>
    %344 = arith.mulf %339, %343 : vector<8x32xf32>
    %345 = arith.truncf %344 : vector<8x32xf32> to vector<8x32xbf16>
    %cst_82 = arith.constant dense<0.000000e+00> : vector<8x128xf32>
    %346 = tpu.matmul %345, %20, %cst_82 {dimension_numbers = #tpu.dot_dimension_numbers<[1], [0], [0], [1], [0, 0, 1, 1], [], []>} : vector<8x32xbf16>, vector<32x128xbf16>, vector<8x128xf32> -> vector<8x128xf32>
    %347 = vector.extract_strided_slice %30 {offsets = [48, 0], sizes = [8, 128], strides = [1, 1]} : vector<56x128xf32> to vector<8x128xf32>
    %348 = arith.addf %346, %347 : vector<8x128xf32>
    %cst_83 = arith.constant 5.000000e-01 : f32
    %349 = vector.broadcast %cst_83 : f32 to vector<8x128xf32>
    %350 = arith.mulf %349, %348 : vector<8x128xf32>
    %351 = math.tanh %350 : vector<8x128xf32>
    %cst_84 = arith.constant 5.000000e-01 : f32
    %352 = vector.broadcast %cst_84 : f32 to vector<8x128xf32>
    %353 = arith.mulf %352, %351 : vector<8x128xf32>
    %cst_85 = arith.constant 5.000000e-01 : f32
    %354 = vector.broadcast %cst_85 : f32 to vector<8x128xf32>
    %355 = arith.addf %353, %354 : vector<8x128xf32>
    %c48 = arith.constant 48 : index
    %c0_86 = arith.constant 0 : index
    %356 = vector.load %arg11[%c48, %c0_86] : memref<56x128xf32, #tpu.memory_space<vmem>>, vector<8x128xf32>
    tpu.vector_store %arg11[%c48, %c0_86], %355 {strides = array<i32>} : memref<56x128xf32, #tpu.memory_space<vmem>>, vector<8x128xf32>,
    return
  }
}

</mosaic_0001>

<bundles_post_ra>
// kernel: tpu_custom_call.1
= control target key start
LH: loop header
LB: loop body
LE: loop exit
PB: predicated region body
PF: predicated region fallthrough
CT: control target
= control target key end

     0   :  { %s3098_s0 = inlined_call_operand.vmem [shape: bf16[56,32], index: 0, kind: input, shape index: {}]   ;;  %s3099_s1 = inlined_call_operand.vmem [shape: bf16[56,32], index: 1, kind: input, shape index: {}]   ;;  %s3100_s2 = inlined_call_operand.vmem [shape: bf16[32,128], index: 2, kind: input, shape index: {}]   ;;  %s3101_s3 = inlined_call_operand.vmem [shape: bf16[32,128], index: 3, kind: input, shape index: {}]   ;;  %s3102_s4 = inlined_call_operand.vmem [shape: f32[1,128], index: 4, kind: input, shape index: {}]   ;;  %s3103_s5 = inlined_call_operand.vmem [shape: bf16[32,128], index: 5, kind: input, shape index: {}]   ;;  %s3104_s6 = inlined_call_operand.vmem [shape: bf16[32,128], index: 6, kind: input, shape index: {}]   ;;  %s3105_s7 = inlined_call_operand.vmem [shape: f32[1,128], index: 7, kind: input, shape index: {}]   ;;  %s3106_s8 = inlined_call_operand.vmem [shape: bf16[32,128], index: 8, kind: input, shape index: {}]   ;;  %s3107_s9 = inlined_call_operand.hbm [shape: bf16[32,128], index: 9, kind: input, shape index: {}]   ;;  %s3108_s10 = inlined_call_operand.<no memory space> [shape: f32[1,1], index: 10, kind: input, shape index: {}]   ;;  %s3109_s11 = inlined_call_operand.hbm [shape: f32[56,128], index: 11, kind: output, shape index: {}]  }
   0x1   :  { %v16_v0 = vstv %s3108_s10 }
   0x2   :  { %17 = vst [vmem:[#allocation2] sm:$0x1] %v16_v0 }
   0x3   :  { %18 = vsyncpa [#allocation4], 0 }
   0x4   :  { %19 = vsyncpa [#allocation5], 0  ;;  %s2518_s19 = smov [#allocation3]  }
   0x5   :  { %s43_s20 = sshll.u32 %s2518_s19, 4  ;;  %s44_s20 = int_to_ptr.vmem [resolvable:$true] %s43_s20 }
   0x6   :  { %s2482_s21 = scalar_lea.vmem %s44_s20, 256  ;;  %p2487_p1 = scmp.lt.s32.totalorder %s44_s20, %s44_s20 }
   0x7   :  { %p2483_p0 = scmp.ne.s32.totalorder %s44_s20, %s2482_s21  ;;  %p2488_p2 = scmp.lt.s32.totalorder %s2482_s21, %s2482_s21 }
   0x9   :  { %p2489_p3 = por %p2488_p2, %p2487_p1 }
   0xb   :  { %p2490_p4 = pnand %p2489_p3, %p2483_p0 }
   0xd   :  { %2493 = shalt.err (!%p2490_p4)
}
   0xe   :  { %s2519_s22 = smov 64   ;;  %s2520_s23 = smov 4  }
   0xf   :  { %49 = dma.hbm_to_vmem [thread:$0]  %s3107_s9, 256, %s44_s20, [#allocation4], %s2519_s22, %s2519_s22, %s2520_s23  }
  0x10   :  { %2514 = dma.done.wait [#allocation4], 256  }
  0x11   :  { %2515 = vsyncadd [#allocation4], 4294967040  ;;  %v2521_v1 = vmov 0   ;;  %v2380_v2 = vld [vmem:[%s3100_s2 + $0x8] sm:$0xff]   ;;  %v2381_v3 = vld [vmem:[%s3100_s2] sm:$0xff]   ;;  %vm134_vm0 = vcmask 261120   ;;  %v56_v15 = vlaneseq }
  0x12   :  { %2379 = vset.pattern.permute.xlu0 %v2521_v1  ;;  %2120 = vmatprep.subr.bf16.mxu0 %v2380_v2  ;;  %v2382_v4 = vld [vmem:[%s3098_s0] sm:$0xff]   ;;  %v2383_v5 = vld [vmem:[%s3098_s0 + $0x8] sm:$0xff]   ;;  %v2385_v7 = vld [vmem:[%s3098_s0 + $0x10] sm:$0xff]   ;;  %v2522_v8 = vmov 0.0   ;;  %vm2523_vm1 = vmmov 0   ;;  %v2524_v29 = vmov 0.5  }
  0x13   :  { %2121 = vmatpush3.bf16.msra.mxu0 %v2380_v2  ;;  %2124 = vmatprep.mubr.msk.bf16.mxu0 %vm134_vm0, %v2382_v4  ;;  %v2614_v6 = vld [vmem:[%s3101_s3 + $0x8] sm:$0xff]   ;;  %v2623_v9 = vld [vmem:[%s3101_s3] sm:$0xff]   ;;  %v2386_v10 = vld [vmem:[%s3098_s0 + $0x18] ss:$0 sps:$4 sm:$0xff]   ;;  %v57_v19 = vand.u32 127, %v56_v15  ;;  %s2525_s0 = smov 32  }
  0x14   :  { %2122 = vmatprep.subr.bf16.mxu0 %v2381_v3  ;;  %v1968_v11 = vld [vmem:[%s3102_s4] ss:$0 sm:$0xff]  ;;  %v2388_v46 = vld [vmem:[#allocation3 + $0x8] sm:$0xff]   ;;  %v2389_v47 = vld [vmem:[#allocation3] sm:$0xff]  }
  0x15   :  { %vm58_vm2 = vcmp.ge.s32.totalorder %v57_v19, 64  ;;  %vm59_vm3 = vcmp.lt.s32.totalorder %v57_v19, 96  ;;  %v2390_v48 = vld [vmem:[%s3099_s1] sm:$0xff]   ;;  %2132 = vmatprep.subr.bf16.mxu1 %v2388_v46  ;;  %v2674_v49 = vld [vmem:[%s3103_s5 + $0x8] sm:$0xff]   ;;  %v2393_v53 = vld [vmem:[%s3099_s1 + $0x10] sm:$0xff]  }
  0x16   :  { %vm60_vm4 = vmand %vm58_vm2, %vm59_vm3  ;;  %2136 = vmatprep.mubr.msk.bf16.mxu1 %vm134_vm0, %v2390_v48  ;;  %2133 = vmatpush3.bf16.msra.mxu1 %v2388_v46  ;;  %v2680_v50 = vld [vmem:[%s3103_s5] sm:$0xff]   ;;  %v2391_v51 = vld [vmem:[%s3099_s1 + $0x8] sm:$0xff]  }
  0x17   :  { %2123 = vmatpush3.bf16.msra.mxu0 %v2381_v3  ;;  %v2655_v30 = vsel %vm60_vm4, 1.0, %v2524_v29  ;;  %v2658_v38 = vsel %vm60_vm4, 0.0, %v2524_v29  ;;  %2134 = vmatprep.subr.bf16.mxu1 %v2389_v47  ;;  %v2689_v52 = vld [vmem:[%s3104_s6 + $0x8] sm:$0xff]   ;;  %v2704_v55 = vld [vmem:[%s3104_s6] sm:$0xff]   ;;  %v2394_v56 = vld [vmem:[%s3099_s1 + $0x18] ss:$0 sps:$4 sm:$0xff]  }
  0x18   :  { %2144 = vmatprep.subr.bf16.mxu0 %v2522_v8 }
  0x1a   :  { %2125 = vmatmul.mubr.msk.bf16.vlgmr.msra.gmra.mxu0 %vm134_vm0, %v2383_v5  ;;  %2135 = vmatpush3.bf16.msra.mxu1 %v2389_v47 }
  0x1b   :  { %2145 = vmatpush3.bf16.msra.mxu0 %v2614_v6  ;;  %2128 = vmatprep.mubr.msk.bf16.mxu0 %vm134_vm0, %v2385_v7 }
  0x1c   :  { %2146 = vmatprep.subr.bf16.mxu0 %v2522_v8  ;;  %2152 = vmatprep.subr.bf16.mxu1 %v2522_v8 }
  0x1d   :  { %2137 = vmatmul.mubr.msk.bf16.vlgmr.msra.gmra.mxu1 %vm134_vm0, %v2391_v51 }
  0x1e   :  { %2153 = vmatpush3.bf16.msra.mxu1 %v2689_v52  ;;  %2140 = vmatprep.mubr.msk.bf16.mxu1 %vm134_vm0, %v2393_v53  ;;  %v2774_v53 = vld [vmem:[%s3106_s8 + $0x8] sm:$0xff]  }
  0x1f   :  { %2147 = vmatpush3.bf16.msra.mxu0 %v2623_v9  ;;  %2154 = vmatprep.subr.bf16.mxu1 %v2522_v8 }
  0x20   :  { %2160 = vmatprep.subr.bf16.mxu0 %v2522_v8 }
  0x22   :  { %2129 = vmatmul.mubr.msk.bf16.gmra.mxu0 %vm134_vm0, %v2386_v10  ;;  %2155 = vmatpush3.bf16.msra.mxu1 %v2704_v55 }
  0x23   :  { %2148 = vmatprep.mubr.msk.bf16.mxu0 %vm2523_vm1, %v2522_v8  ;;  %2168 = vmatprep.subr.bf16.mxu1 %v2522_v8 }
  0x25   :  { %2141 = vmatmul.mubr.msk.bf16.gmra.mxu1 %vm134_vm0, %v2394_v56  ;;  %v2780_v56 = vld [vmem:[%s3106_s8] sm:$0xff]  }
  0x26   :  { %2156 = vmatprep.mubr.msk.bf16.mxu1 %vm2523_vm1, %v2522_v8 }
  0x2a   :  { %2149 = vmatmul.mubr.bf16.vlgmr.msra.gmra.mxu0 %v2521_v1 }
  0x2b   :  { %2164 = vmatprep.mubr.msk.bf16.mxu0 %vm2523_vm1, %v2522_v8  ;;  %2161 = vmatpush3.bf16.msra.mxu0 %v2674_v49 }
  0x2c   :  { %2162 = vmatprep.subr.bf16.mxu0 %v2522_v8 }
  0x2d   :  { %2157 = vmatmul.mubr.bf16.vlgmr.msra.gmra.mxu1 %v2521_v1 }
  0x2e   :  { %2172 = vmatprep.mubr.msk.bf16.mxu1 %vm2523_vm1, %v2522_v8  ;;  %2169 = vmatpush3.bf16.msra.mxu1 %v2774_v53 }
  0x2f   :  { %2163 = vmatpush3.bf16.msra.mxu0 %v2680_v50  ;;  %2170 = vmatprep.subr.bf16.mxu1 %v2522_v8 }
  0x30   :  { %2176 = vmatprep.subr.bf16.mxu0 %v2522_v8 }
  0x32   :  { %2171 = vmatpush3.bf16.msra.mxu1 %v2780_v56 }
  0x33   :  { %2184 = vmatprep.subr.bf16.mxu1 %v2522_v8 }
  0xda   :  { %v2126_v12 = vpop.f32.mrf.mxu0 }
  0xdb   :  { %v2643_v13 = vadd.f32 %v2126_v12, %v1968_v11  ;;  %v2750_v12 = vld [vmem:[%s3105_s7] ss:$0 sm:$0xff] }
  0xdc   :  { %v181_v14 = vpop.f32.mrf.mxu0 }
  0xdd   :  { %v182_v27 = vadd.f32 %v1968_v11, %v181_v14  ;;  %v2719_v60 = vpop.f32.mrf.mxu1 }
  0xde   :  { %v2127_v16 = vpop.f32.mrf.mxu0 }
  0xdf   :  { %v2645_v17 = vadd.f32 %v2127_v16, %v1968_v11  ;;  %v2721_v61 = vpop.f32.mrf.mxu1 }
  0xe0   :  { %v184_v18 = vpop.f32.mrf.mxu0 }
  0xe1   :  { %v2647_v20 = vadd.f32 %v1968_v11, %v184_v18  ;;  %v2723_v62 = vpop.f32.mrf.mxu1 }
  0xe2   :  { %v2130_v21 = vpop.f32.mrf.mxu0 }
  0xe3   :  { %v2649_v22 = vadd.f32 %v2130_v21, %v1968_v11  ;;  %v2725_v63 = vpop.f32.mrf.mxu1 }
  0xe4   :  { %v197_v23 = vpop.f32.mrf.mxu0 }
  0xe5   :  { %v2651_v24 = vadd.f32 %v1968_v11, %v197_v23  ;;  %v2727_v0 = vpop.f32.mrf.mxu1 }
  0xe6   :  { %v2131_v25 = vpop.f32.mrf.mxu0 }
  0xe7   :  { %v2729_v2 = vpop.f32.mrf.mxu1 }
  0xe8   :  { %v200_v26 = vpop.f32.mrf.mxu0 }
  0xe9   :  { %v2653_v28 = vadd.f32 %v1968_v11, %v200_v26  ;;  %v2143_v1 = vpop.f32.mrf.mxu1 }
  0xea   :  { %v387_v31 = vpop.f32.mrf.mxu0 }
  0xeb   :  { %v393_v32 = vadd.f32 %v387_v31, %v182_v27  ;;  %v2731_v3 = vpop.f32.mrf.mxu1 }
  0xec   :  { %v2150_v33 = vpop.f32.mrf.mxu0 }
  0xed   :  { %v394_v34 = vmul.f32 %v393_v32, %v2655_v30  ;;  %v462_v4 = vpop.f32.mrf.mxu1 }
  0xee   :  { %v390_v35 = vpop.f32.mrf.mxu0 }
  0xef   :  { %2400 = vtanh.f32 %v394_v34  ;;  %v2158_v5 = vpop.f32.mrf.mxu1 }
  0xf0   :  { %v2151_v36 = vpop.f32.mrf.mxu0 }
  0xf1   :  { %v465_v7 = vpop.f32.mrf.mxu1 }
  0xf3   :  { %v2159_v10 = vpop.f32.mrf.mxu1 }
  0xfc   :  { %v2401_v37 = vpop.eup %2400 }
  0xfd   :  { %v396_v39 = vmul.f32 %v2401_v37, %v2655_v30 }
  0xff   :  { %v397_v40 = vadd.f32 %v396_v39, %v2658_v38 }
 0x101   :  { %400 = vrot.lane.b32.xlu0 %v397_v40, %s2519_s22  ;;  %v398_v43 = vmul.f32 0.0, %v397_v40 }
 0x173   :  { %v401_v41 = vpop.permute.xlu0 %400 }
 0x174   :  { %v403_v42 = vmul.f32 %v401_v41, %v397_v40 }
 0x176   :  { %405 = vrot.lane.b32.xlu0 %v403_v42, %s2525_s0 }
 0x1e8   :  { %v406_v44 = vpop.permute.xlu0 %405 }
 0x1e9   :  { %v2664_v45 = vadd.f32 %v406_v44, %v398_v43 }
 0x1eb   :  { %2402 = vtanh.f32 %v2664_v45 }
 0x1f8   :  { %v2403_v54 = vpop.eup %2402 }
 0x1f9   :  { %411 = vrot.lane.b32.xlu1 %v2403_v54, %s2519_s22 }
 0x26b   :  { %v412_v57 = vpop.permute.xlu1 %411 }
 0x26c   :  { %v414_v58 = vmul.f32 %v412_v57, %v397_v40 }
 0x26e   :  { %v415_v59 = vpack.c.bf16 %v414_v58, %v414_v58 }
 0x270   :  { %469 = vrot.lane.b32.xlu1 %v415_v59, %s2525_s0 }
 0x2e2   :  { %v470_v11 = vpop.permute.xlu1 %469 }
 0x2e3   :  { %2165 = vmatmul.mubr.msk.bf16.vlgmr.msra.gmra.mxu0 %vm134_vm0, %v470_v11 }
 0x2e4   :  { %2177 = vmatpush3.bf16.msra.mxu0 %v2614_v6  ;;  %2180 = vmatprep.mubr.msk.bf16.mxu0 %vm2523_vm1, %v2522_v8 }
 0x2e5   :  { %2178 = vmatprep.subr.bf16.mxu0 %v2522_v8 }
 0x2e8   :  { %2179 = vmatpush3.bf16.msra.mxu0 %v2623_v9 }
 0x2e9   :  { %2192 = vmatprep.subr.bf16.mxu0 %v2522_v8 }
 0x2eb   :  { %2181 = vmatmul.mubr.msk.bf16.vlgmr.msra.gmra.mxu0 %vm134_vm0, %v470_v11 }
 0x2ec   :  { %2193 = vmatpush3.bf16.msra.mxu0 %v2674_v49  ;;  %2196 = vmatprep.mubr.msk.bf16.mxu0 %vm2523_vm1, %v2522_v8 }
 0x2ed   :  { %2194 = vmatprep.subr.bf16.mxu0 %v2522_v8 }
 0x2f0   :  { %2195 = vmatpush3.bf16.msra.mxu0 %v2680_v50 }
 0x2f1   :  { %2208 = vmatprep.subr.bf16.mxu0 %v2522_v8 }
 0x3a3   :  { %v520_v14 = vpop.f32.mrf.mxu0 }
 0x3a4   :  { %v521_v15 = vadd.f32 %v2750_v12, %v520_v14 }
 0x3a5   :  { %v2166_v16 = vpop.f32.mrf.mxu0 }
 0x3a6   :  { %v526_v18 = vadd.f32 %v521_v15, %v462_v4 }
 0x3a7   :  { %v523_v19 = vpop.f32.mrf.mxu0 }
 0x3a8   :  { %v527_v21 = vmul.f32 %v526_v18, %v2655_v30 }
 0x3a9   :  { %v2167_v23 = vpop.f32.mrf.mxu0 }
 0x3aa   :  { %2404 = vtanh.f32 %v527_v21 }
 0x3ab   :  { %v646_v25 = vpop.f32.mrf.mxu0 }
 0x3ac   :  { %v652_v26 = vadd.f32 %v646_v25, %v2647_v20 }
 0x3ad   :  { %v2182_v27 = vpop.f32.mrf.mxu0 }
 0x3ae   :  { %v653_v29 = vmul.f32 %v652_v26, %v2655_v30 }
 0x3af   :  { %v649_v31 = vpop.f32.mrf.mxu0 }
 0x3b0   :  { %2406 = vtanh.f32 %v653_v29 }
 0x3b1   :  { %v2183_v32 = vpop.f32.mrf.mxu0 }
 0x3b7   :  { %v2405_v33 = vpop.eup %2404 }
 0x3b8   :  { %v529_v34 = vmul.f32 %v2405_v33, %v2655_v30 }
 0x3ba   :  { %v530_v35 = vadd.f32 %v529_v34, %v2658_v38 }
 0x3bc   :  { %533 = vrot.lane.b32.xlu0 %v530_v35, %s2519_s22  ;;  %v531_v43 = vmul.f32 0.0, %v530_v35 }
 0x3bd   :  { %v2407_v36 = vpop.eup %2406 }
 0x3be   :  { %v655_v37 = vmul.f32 %v2407_v36, %v2655_v30 }
 0x3c0   :  { %v656_v39 = vadd.f32 %v655_v37, %v2658_v38 }
 0x3c2   :  { %659 = vrot.lane.b32.xlu1 %v656_v39, %s2519_s22  ;;  %v657_v47 = vmul.f32 %v656_v39, %v2664_v45 }
 0x42e   :  { %v534_v20 = vpop.permute.xlu0 %533 }
 0x42f   :  { %v536_v40 = vmul.f32 %v534_v20, %v530_v35 }
 0x431   :  { %538 = vrot.lane.b32.xlu0 %v536_v40, %s2525_s0 }
 0x434   :  { %v660_v41 = vpop.permute.xlu1 %659 }
 0x435   :  { %v662_v42 = vmul.f32 %v660_v41, %v656_v39 }
 0x437   :  { %664 = vrot.lane.b32.xlu1 %v662_v42, %s2525_s0 }
 0x4a3   :  { %v539_v44 = vpop.permute.xlu0 %538 }
 0x4a4   :  { %v2764_v46 = vadd.f32 %v539_v44, %v531_v43 }
 0x4a6   :  { %2408 = vtanh.f32 %v2764_v46 }
 0x4a9   :  { %v665_v48 = vpop.permute.xlu1 %664 }
 0x4aa   :  { %v2768_v51 = vadd.f32 %v665_v48, %v657_v47 }
 0x4ac   :  { %2410 = vtanh.f32 %v2768_v51 }
 0x4b3   :  { %v2409_v54 = vpop.eup %2408 }
 0x4b4   :  { %544 = vrot.lane.b32.xlu0 %v2409_v54, %s2519_s22 }
 0x4b9   :  { %v2411_v45 = vpop.eup %2410 }
 0x4ba   :  { %670 = vrot.lane.b32.xlu1 %v2411_v45, %s2519_s22 }
 0x526   :  { %v545_v57 = vpop.permute.xlu0 %544 }
 0x527   :  { %v547_v58 = vmul.f32 %v545_v57, %v530_v35 }
 0x529   :  { %v548_v59 = vpack.c.bf16 %v547_v58, %v547_v58 }
 0x52b   :  { %550 = vrot.lane.b32.xlu0 %v548_v59, %s2525_s0 }
 0x52c   :  { %v671_v1 = vpop.permute.xlu1 %670 }
 0x52d   :  { %v673_v4 = vmul.f32 %v671_v1, %v656_v39 }
 0x52f   :  { %v674_v5 = vpack.c.bf16 %v673_v4, %v673_v4 }
 0x531   :  { %716 = vrot.lane.b32.xlu1 %v674_v5, %s2525_s0 }
 0x59d   :  { %v551_v7 = vpop.permute.xlu0 %550 }
 0x59e   :  { %2173 = vmatmul.mubr.msk.bf16.vlgmr.msra.gmra.mxu1 %vm134_vm0, %v551_v7 }
 0x59f   :  { %2185 = vmatpush3.bf16.msra.mxu1 %v2689_v52  ;;  %2188 = vmatprep.mubr.msk.bf16.mxu1 %vm2523_vm1, %v2522_v8 }
 0x5a0   :  { %2186 = vmatprep.subr.bf16.mxu1 %v2522_v8 }
 0x5a3   :  { %2187 = vmatpush3.bf16.msra.mxu1 %v2704_v55  ;;  %v717_v10 = vpop.permute.xlu1 %716 }
 0x5a4   :  { %2197 = vmatmul.mubr.msk.bf16.vlgmr.msra.gmra.mxu0 %vm134_vm0, %v717_v10  ;;  %2200 = vmatprep.subr.bf16.mxu1 %v2522_v8 }
 0x5a5   :  { %2209 = vmatpush3.bf16.msra.mxu0 %v2614_v6  ;;  %2212 = vmatprep.mubr.msk.bf16.mxu0 %vm2523_vm1, %v2522_v8 }
 0x5a6   :  { %2189 = vmatmul.mubr.msk.bf16.vlgmr.msra.gmra.mxu1 %vm134_vm0, %v551_v7  ;;  %2210 = vmatprep.subr.bf16.mxu0 %v2522_v8 }
 0x5a7   :  { %2201 = vmatpush3.bf16.msra.mxu1 %v2774_v53  ;;  %2204 = vmatprep.mubr.msk.bf16.mxu1 %vm2523_vm1, %v2522_v8 }
 0x5a8   :  { %2202 = vmatprep.subr.bf16.mxu1 %v2522_v8 }
 0x5a9   :  { %2211 = vmatpush3.bf16.msra.mxu0 %v2623_v9 }
 0x5aa   :  { %2224 = vmatprep.subr.bf16.mxu0 %v2522_v8 }
 0x5ab   :  { %2203 = vmatpush3.bf16.msra.mxu1 %v2780_v56 }
 0x5ac   :  { %2213 = vmatmul.mubr.msk.bf16.vlgmr.msra.gmra.mxu0 %vm134_vm0, %v717_v10  ;;  %2216 = vmatprep.subr.bf16.mxu1 %v2522_v8 }
 0x5ad   :  { %2225 = vmatpush3.bf16.msra.mxu0 %v2674_v49  ;;  %2228 = vmatprep.mubr.msk.bf16.mxu0 %vm2523_vm1, %v2522_v8 }
 0x5ae   :  { %2226 = vmatprep.subr.bf16.mxu0 %v2522_v8 }
 0x5b1   :  { %2227 = vmatpush3.bf16.msra.mxu0 %v2680_v50 }
 0x5b2   :  { %2240 = vmatprep.subr.bf16.mxu0 %v2522_v8 }
 0x65e   :  { %v2817_v11 = vpop.f32.mrf.mxu1 }
 0x660   :  { %v2174_v14 = vpop.f32.mrf.mxu1 }
 0x662   :  { %v604_v15 = vpop.f32.mrf.mxu1 }
 0x664   :  { %v2175_v16 = vpop.f32.mrf.mxu1  ;;  %v755_v18 = vpop.f32.mrf.mxu0 }
 0x665   :  { %v756_v19 = vadd.f32 %v2750_v12, %v755_v18 }
 0x666   :  { %v709_v21 = vpop.f32.mrf.mxu1  ;;  %v2198_v23 = vpop.f32.mrf.mxu0 }
 0x667   :  { %v761_v25 = vadd.f32 %v756_v19, %v709_v21 }
 0x668   :  { %v2190_v26 = vpop.f32.mrf.mxu1  ;;  %v758_v27 = vpop.f32.mrf.mxu0 }
 0x669   :  { %v762_v29 = vmul.f32 %v761_v25, %v2655_v30 }
 0x66a   :  { %v712_v31 = vpop.f32.mrf.mxu1  ;;  %v2199_v32 = vpop.f32.mrf.mxu0 }
 0x66b   :  { %2412 = vtanh.f32 %v762_v29 }
 0x66c   :  { %v2191_v33 = vpop.f32.mrf.mxu1  ;;  %v869_v34 = vpop.f32.mrf.mxu0 }
 0x66d   :  { %v875_v35 = vadd.f32 %v869_v34, %v2643_v13 }
 0x66e   :  { %v2214_v36 = vpop.f32.mrf.mxu0 }
 0x66f   :  { %v876_v37 = vmul.f32 %v875_v35, %v2655_v30 }
 0x670   :  { %v872_v39 = vpop.f32.mrf.mxu0 }
 0x671   :  { %2414 = vtanh.f32 %v876_v37 }
 0x672   :  { %v2215_v20 = vpop.f32.mrf.mxu0 }
 0x678   :  { %v2413_v40 = vpop.eup %2412 }
 0x679   :  { %v764_v41 = vmul.f32 %v2413_v40, %v2655_v30 }
 0x67b   :  { %v765_v42 = vadd.f32 %v764_v41, %v2658_v38 }
 0x67d   :  { %768 = vrot.lane.b32.xlu0 %v765_v42, %s2519_s22  ;;  %v766_v57 = vmul.f32 %v765_v42, %v2764_v46 }
 0x67e   :  { %v2415_v43 = vpop.eup %2414 }
 0x67f   :  { %v878_v44 = vmul.f32 %v2415_v43, %v2655_v30 }
 0x681   :  { %v879_v47 = vadd.f32 %v878_v44, %v2658_v38 }
 0x683   :  { %882 = vrot.lane.b32.xlu1 %v879_v47, %s2519_s22  ;;  %v880_v1 = vmul.f32 %v879_v47, %v2768_v51 }
 0x6ef   :  { %v769_v13 = vpop.permute.xlu0 %768 }
 0x6f0   :  { %v771_v48 = vmul.f32 %v769_v13, %v765_v42 }
 0x6f2   :  { %773 = vrot.lane.b32.xlu0 %v771_v48, %s2525_s0 }
 0x6f5   :  { %v883_v54 = vpop.permute.xlu1 %882 }
 0x6f6   :  { %v885_v45 = vmul.f32 %v883_v54, %v879_v47 }
 0x6f8   :  { %887 = vrot.lane.b32.xlu1 %v885_v45, %s2525_s0 }
 0x764   :  { %v774_v58 = vpop.permute.xlu0 %773 }
 0x765   :  { %v2832_v59 = vadd.f32 %v774_v58, %v766_v57 }
 0x767   :  { %2416 = vtanh.f32 %v2832_v59 }
 0x76a   :  { %v888_v4 = vpop.permute.xlu1 %887 }
 0x76b   :  { %v2836_v5 = vadd.f32 %v888_v4, %v880_v1 }
 0x76d   :  { %2418 = vtanh.f32 %v2836_v5 }
 0x774   :  { %v2417_v7 = vpop.eup %2416 }
 0x775   :  { %779 = vrot.lane.b32.xlu0 %v2417_v7, %s2519_s22 }
 0x77a   :  { %v2419_v10 = vpop.eup %2418 }
 0x77b   :  { %893 = vrot.lane.b32.xlu1 %v2419_v10, %s2519_s22 }
 0x7e7   :  { %v780_v14 = vpop.permute.xlu0 %779 }
 0x7e8   :  { %v782_v46 = vmul.f32 %v780_v14, %v765_v42 }
 0x7ea   :  { %v783_v15 = vpack.c.bf16 %v782_v46, %v782_v46 }
 0x7ec   :  { %785 = vrot.lane.b32.xlu0 %v783_v15, %s2525_s0 }
 0x7ed   :  { %v894_v16 = vpop.permute.xlu1 %893 }
 0x7ee   :  { %v896_v18 = vmul.f32 %v894_v16, %v879_v47 }
 0x7f0   :  { %v897_v19 = vpack.c.bf16 %v896_v18, %v896_v18 }
 0x7f2   :  { %939 = vrot.lane.b32.xlu1 %v897_v19, %s2525_s0 }
 0x85e   :  { %v786_v51 = vpop.permute.xlu0 %785 }
 0x85f   :  { %2205 = vmatmul.mubr.msk.bf16.vlgmr.msra.gmra.mxu1 %vm134_vm0, %v786_v51 }
 0x860   :  { %2217 = vmatpush3.bf16.msra.mxu1 %v2689_v52  ;;  %2220 = vmatprep.mubr.msk.bf16.mxu1 %vm2523_vm1, %v2522_v8 }
 0x861   :  { %2218 = vmatprep.subr.bf16.mxu1 %v2522_v8 }
 0x864   :  { %2219 = vmatpush3.bf16.msra.mxu1 %v2704_v55  ;;  %v940_v21 = vpop.permute.xlu1 %939 }
 0x865   :  { %2229 = vmatmul.mubr.msk.bf16.vlgmr.msra.gmra.mxu0 %vm134_vm0, %v940_v21  ;;  %2232 = vmatprep.subr.bf16.mxu1 %v2522_v8 }
 0x866   :  { %2241 = vmatpush3.bf16.msra.mxu0 %v2614_v6  ;;  %2244 = vmatprep.mubr.msk.bf16.mxu0 %vm2523_vm1, %v2522_v8 }
 0x867   :  { %2221 = vmatmul.mubr.msk.bf16.vlgmr.msra.gmra.mxu1 %vm134_vm0, %v786_v51  ;;  %2242 = vmatprep.subr.bf16.mxu0 %v2522_v8 }
 0x868   :  { %2233 = vmatpush3.bf16.msra.mxu1 %v2774_v53  ;;  %2236 = vmatprep.mubr.msk.bf16.mxu1 %vm2523_vm1, %v2522_v8 }
 0x869   :  { %2234 = vmatprep.subr.bf16.mxu1 %v2522_v8 }
 0x86a   :  { %2243 = vmatpush3.bf16.msra.mxu0 %v2623_v9 }
 0x86b   :  { %2256 = vmatprep.subr.bf16.mxu0 %v2522_v8 }
 0x86c   :  { %2235 = vmatpush3.bf16.msra.mxu1 %v2780_v56 }
 0x86d   :  { %2245 = vmatmul.mubr.msk.bf16.vlgmr.msra.gmra.mxu0 %vm134_vm0, %v940_v21  ;;  %2248 = vmatprep.subr.bf16.mxu1 %v2522_v8 }
 0x86e   :  { %2257 = vmatpush3.bf16.msra.mxu0 %v2674_v49  ;;  %2260 = vmatprep.mubr.msk.bf16.mxu0 %vm2523_vm1, %v2522_v8 }
 0x86f   :  { %2258 = vmatprep.subr.bf16.mxu0 %v2522_v8 }
 0x872   :  { %2259 = vmatpush3.bf16.msra.mxu0 %v2680_v50 }
 0x873   :  { %2272 = vmatprep.subr.bf16.mxu0 %v2522_v8 }
 0x91f   :  { %v2871_v23 = vpop.f32.mrf.mxu1 }
 0x921   :  { %v2206_v25 = vpop.f32.mrf.mxu1 }
 0x923   :  { %v827_v26 = vpop.f32.mrf.mxu1 }
 0x925   :  { %v2207_v27 = vpop.f32.mrf.mxu1  ;;  %v978_v29 = vpop.f32.mrf.mxu0 }
 0x926   :  { %v979_v31 = vadd.f32 %v2750_v12, %v978_v29 }
 0x927   :  { %v932_v32 = vpop.f32.mrf.mxu1  ;;  %v2230_v33 = vpop.f32.mrf.mxu0 }
 0x928   :  { %v984_v34 = vadd.f32 %v979_v31, %v932_v32 }
 0x929   :  { %v2222_v35 = vpop.f32.mrf.mxu1  ;;  %v981_v36 = vpop.f32.mrf.mxu0 }
 0x92a   :  { %v985_v37 = vmul.f32 %v984_v34, %v2655_v30 }
 0x92b   :  { %v935_v39 = vpop.f32.mrf.mxu1  ;;  %v2231_v20 = vpop.f32.mrf.mxu0 }
 0x92c   :  { %2420 = vtanh.f32 %v985_v37 }
 0x92d   :  { %v2223_v40 = vpop.f32.mrf.mxu1  ;;  %v1092_v41 = vpop.f32.mrf.mxu0 }
 0x92e   :  { %v1098_v42 = vadd.f32 %v1092_v41, %v2645_v17 }
 0x92f   :  { %v2246_v43 = vpop.f32.mrf.mxu0 }
 0x930   :  { %v1099_v44 = vmul.f32 %v1098_v42, %v2655_v30 }
 0x931   :  { %v1095_v47 = vpop.f32.mrf.mxu0 }
 0x932   :  { %2422 = vtanh.f32 %v1099_v44 }
 0x933   :  { %v2247_v13 = vpop.f32.mrf.mxu0 }
 0x939   :  { %v2421_v48 = vpop.eup %2420 }
 0x93a   :  { %v987_v54 = vmul.f32 %v2421_v48, %v2655_v30 }
 0x93c   :  { %v988_v45 = vadd.f32 %v987_v54, %v2658_v38 }
 0x93e   :  { %991 = vrot.lane.b32.xlu0 %v988_v45, %s2519_s22  ;;  %v989_v14 = vmul.f32 %v988_v45, %v2832_v59 }
 0x93f   :  { %v2423_v57 = vpop.eup %2422 }
 0x940   :  { %v1101_v58 = vmul.f32 %v2423_v57, %v2655_v30 }
 0x942   :  { %v1102_v1 = vadd.f32 %v1101_v58, %v2658_v38 }
 0x944   :  { %1105 = vrot.lane.b32.xlu1 %v1102_v1, %s2519_s22  ;;  %v1103_v16 = vmul.f32 %v1102_v1, %v2836_v5 }
 0x9b0   :  { %v992_v17 = vpop.permute.xlu0 %991 }
 0x9b1   :  { %v994_v4 = vmul.f32 %v992_v17, %v988_v45 }
 0x9b3   :  { %996 = vrot.lane.b32.xlu0 %v994_v4, %s2525_s0 }
 0x9b6   :  { %v1106_v7 = vpop.permute.xlu1 %1105 }
 0x9b7   :  { %v1108_v10 = vmul.f32 %v1106_v7, %v1102_v1 }
 0x9b9   :  { %1110 = vrot.lane.b32.xlu1 %v1108_v10, %s2525_s0 }
 0xa25   :  { %v997_v46 = vpop.permute.xlu0 %996 }
 0xa26   :  { %v2886_v15 = vadd.f32 %v997_v46, %v989_v14 }
 0xa28   :  { %2424 = vtanh.f32 %v2886_v15 }
 0xa2b   :  { %v1111_v18 = vpop.permute.xlu1 %1110 }
 0xa2c   :  { %v2890_v19 = vadd.f32 %v1111_v18, %v1103_v16 }
 0xa2e   :  { %2426 = vtanh.f32 %v2890_v19 }
 0xa35   :  { %v2425_v51 = vpop.eup %2424 }
 0xa36   :  { %1002 = vrot.lane.b32.xlu0 %v2425_v51, %s2519_s22 }
 0xa3b   :  { %v2427_v21 = vpop.eup %2426 }
 0xa3c   :  { %1116 = vrot.lane.b32.xlu1 %v2427_v21, %s2519_s22 }
 0xaa8   :  { %v1003_v25 = vpop.permute.xlu0 %1002 }
 0xaa9   :  { %v1005_v59 = vmul.f32 %v1003_v25, %v988_v45 }
 0xaab   :  { %v1006_v26 = vpack.c.bf16 %v1005_v59, %v1005_v59 }
 0xaad   :  { %1008 = vrot.lane.b32.xlu0 %v1006_v26, %s2525_s0 }
 0xaae   :  { %v1117_v27 = vpop.permute.xlu1 %1116 }
 0xaaf   :  { %v1119_v29 = vmul.f32 %v1117_v27, %v1102_v1 }
 0xab1   :  { %v1120_v31 = vpack.c.bf16 %v1119_v29, %v1119_v29 }
 0xab3   :  { %1162 = vrot.lane.b32.xlu1 %v1120_v31, %s2525_s0 }
 0xb1f   :  { %v1009_v5 = vpop.permute.xlu0 %1008 }
 0xb20   :  { %2237 = vmatmul.mubr.msk.bf16.vlgmr.msra.gmra.mxu1 %vm134_vm0, %v1009_v5 }
 0xb21   :  { %2249 = vmatpush3.bf16.msra.mxu1 %v2689_v52  ;;  %2252 = vmatprep.mubr.msk.bf16.mxu1 %vm2523_vm1, %v2522_v8 }
 0xb22   :  { %2250 = vmatprep.subr.bf16.mxu1 %v2522_v8 }
 0xb25   :  { %2251 = vmatpush3.bf16.msra.mxu1 %v2704_v55  ;;  %v1163_v32 = vpop.permute.xlu1 %1162 }
 0xb26   :  { %2261 = vmatmul.mubr.msk.bf16.vlgmr.msra.gmra.mxu0 %vm134_vm0, %v1163_v32  ;;  %2264 = vmatprep.subr.bf16.mxu1 %v2522_v8 }
 0xb27   :  { %2273 = vmatpush3.bf16.msra.mxu0 %v2614_v6  ;;  %2276 = vmatprep.mubr.msk.bf16.mxu0 %vm2523_vm1, %v2522_v8 }
 0xb28   :  { %2253 = vmatmul.mubr.msk.bf16.vlgmr.msra.gmra.mxu1 %vm134_vm0, %v1009_v5  ;;  %2274 = vmatprep.subr.bf16.mxu0 %v2522_v8 }
 0xb29   :  { %2265 = vmatpush3.bf16.msra.mxu1 %v2774_v53  ;;  %2268 = vmatprep.mubr.msk.bf16.mxu1 %vm2523_vm1, %v2522_v8 }
 0xb2a   :  { %2266 = vmatprep.subr.bf16.mxu1 %v2522_v8 }
 0xb2b   :  { %2275 = vmatpush3.bf16.msra.mxu0 %v2623_v9 }
 0xb2c   :  { %2288 = vmatprep.subr.bf16.mxu0 %v2522_v8 }
 0xb2d   :  { %2267 = vmatpush3.bf16.msra.mxu1 %v2780_v56 }
 0xb2e   :  { %2277 = vmatmul.mubr.msk.bf16.vlgmr.msra.gmra.mxu0 %vm134_vm0, %v1163_v32  ;;  %2280 = vmatprep.subr.bf16.mxu1 %v2522_v8 }
 0xb2f   :  { %2289 = vmatpush3.bf16.msra.mxu0 %v2674_v49  ;;  %2292 = vmatprep.mubr.msk.bf16.mxu0 %vm2523_vm1, %v2522_v8 }
 0xb30   :  { %2290 = vmatprep.subr.bf16.mxu0 %v2522_v8 }
 0xb33   :  { %2291 = vmatpush3.bf16.msra.mxu0 %v2680_v50 }
 0xb34   :  { %2304 = vmatprep.subr.bf16.mxu0 %v2522_v8 }
 0xbe0   :  { %v2925_v33 = vpop.f32.mrf.mxu1 }
 0xbe2   :  { %v2238_v34 = vpop.f32.mrf.mxu1 }
 0xbe4   :  { %v1050_v35 = vpop.f32.mrf.mxu1 }
 0xbe6   :  { %v2239_v36 = vpop.f32.mrf.mxu1  ;;  %v1201_v37 = vpop.f32.mrf.mxu0 }
 0xbe7   :  { %v1202_v39 = vadd.f32 %v2750_v12, %v1201_v37 }
 0xbe8   :  { %v1155_v20 = vpop.f32.mrf.mxu1  ;;  %v2262_v40 = vpop.f32.mrf.mxu0 }
 0xbe9   :  { %v1207_v41 = vadd.f32 %v1202_v39, %v1155_v20 }
 0xbea   :  { %v2254_v42 = vpop.f32.mrf.mxu1  ;;  %v1204_v43 = vpop.f32.mrf.mxu0 }
 0xbeb   :  { %v1208_v44 = vmul.f32 %v1207_v41, %v2655_v30 }
 0xbec   :  { %v1158_v47 = vpop.f32.mrf.mxu1  ;;  %v2263_v13 = vpop.f32.mrf.mxu0 }
 0xbed   :  { %2428 = vtanh.f32 %v1208_v44 }
 0xbee   :  { %v2255_v48 = vpop.f32.mrf.mxu1  ;;  %v1315_v54 = vpop.f32.mrf.mxu0 }
 0xbef   :  { %v1321_v45 = vadd.f32 %v1315_v54, %v2651_v24 }
 0xbf0   :  { %v2278_v57 = vpop.f32.mrf.mxu0 }
 0xbf1   :  { %v1322_v58 = vmul.f32 %v1321_v45, %v2655_v30 }
 0xbf2   :  { %v1318_v1 = vpop.f32.mrf.mxu0 }
 0xbf3   :  { %2430 = vtanh.f32 %v1322_v58 }
 0xbf4   :  { %v2279_v17 = vpop.f32.mrf.mxu0 }
 0xbfa   :  { %v2429_v4 = vpop.eup %2428 }
 0xbfb   :  { %v1210_v7 = vmul.f32 %v2429_v4, %v2655_v30 }
 0xbfd   :  { %v1211_v10 = vadd.f32 %v1210_v7, %v2658_v38 }
 0xbff   :  { %1214 = vrot.lane.b32.xlu0 %v1211_v10, %s2519_s22  ;;  %v1212_v25 = vmul.f32 %v1211_v10, %v2886_v15 }
 0xc00   :  { %v2431_v14 = vpop.eup %2430 }
 0xc01   :  { %v1324_v46 = vmul.f32 %v2431_v14, %v2655_v30 }
 0xc03   :  { %v1325_v16 = vadd.f32 %v1324_v46, %v2658_v38 }
 0xc05   :  { %1328 = vrot.lane.b32.xlu1 %v1325_v16, %s2519_s22  ;;  %v1326_v27 = vmul.f32 %v1325_v16, %v2890_v19 }
 0xc71   :  { %v1215_v24 = vpop.permute.xlu0 %1214 }
 0xc72   :  { %v1217_v18 = vmul.f32 %v1215_v24, %v1211_v10 }
 0xc74   :  { %1219 = vrot.lane.b32.xlu0 %v1217_v18, %s2525_s0 }
 0xc77   :  { %v1329_v51 = vpop.permute.xlu1 %1328 }
 0xc78   :  { %v1331_v21 = vmul.f32 %v1329_v51, %v1325_v16 }
 0xc7a   :  { %1333 = vrot.lane.b32.xlu1 %v1331_v21, %s2525_s0 }
 0xce6   :  { %v1220_v59 = vpop.permute.xlu0 %1219 }
 0xce7   :  { %v2940_v26 = vadd.f32 %v1220_v59, %v1212_v25 }
 0xce9   :  { %2432 = vtanh.f32 %v2940_v26 }
 0xcec   :  { %v1334_v29 = vpop.permute.xlu1 %1333 }
 0xced   :  { %v2944_v31 = vadd.f32 %v1334_v29, %v1326_v27 }
 0xcef   :  { %2434 = vtanh.f32 %v2944_v31 }
 0xcf6   :  { %v2433_v5 = vpop.eup %2432 }
 0xcf7   :  { %1225 = vrot.lane.b32.xlu0 %v2433_v5, %s2519_s22 }
 0xcfc   :  { %v2435_v32 = vpop.eup %2434 }
 0xcfd   :  { %1339 = vrot.lane.b32.xlu1 %v2435_v32, %s2519_s22 }
 0xd69   :  { %v1226_v34 = vpop.permute.xlu0 %1225 }
 0xd6a   :  { %v1228_v15 = vmul.f32 %v1226_v34, %v1211_v10 }
 0xd6c   :  { %v1229_v35 = vpack.c.bf16 %v1228_v15, %v1228_v15 }
 0xd6e   :  { %1231 = vrot.lane.b32.xlu0 %v1229_v35, %s2525_s0 }
 0xd6f   :  { %v1340_v36 = vpop.permute.xlu1 %1339 }
 0xd70   :  { %v1342_v37 = vmul.f32 %v1340_v36, %v1325_v16 }
 0xd72   :  { %v1343_v39 = vpack.c.bf16 %v1342_v37, %v1342_v37 }
 0xd74   :  { %1385 = vrot.lane.b32.xlu1 %v1343_v39, %s2525_s0 }
 0xde0   :  { %v1232_v19 = vpop.permute.xlu0 %1231 }
 0xde1   :  { %2269 = vmatmul.mubr.msk.bf16.vlgmr.msra.gmra.mxu1 %vm134_vm0, %v1232_v19 }
 0xde2   :  { %2281 = vmatpush3.bf16.msra.mxu1 %v2689_v52  ;;  %2284 = vmatprep.mubr.msk.bf16.mxu1 %vm2523_vm1, %v2522_v8 }
 0xde3   :  { %2282 = vmatprep.subr.bf16.mxu1 %v2522_v8 }
 0xde6   :  { %2283 = vmatpush3.bf16.msra.mxu1 %v2704_v55  ;;  %v1386_v20 = vpop.permute.xlu1 %1385 }
 0xde7   :  { %2293 = vmatmul.mubr.msk.bf16.vlgmr.msra.gmra.mxu0 %vm134_vm0, %v1386_v20  ;;  %2296 = vmatprep.subr.bf16.mxu1 %v2522_v8 }
 0xde8   :  { %2305 = vmatpush3.bf16.msra.mxu0 %v2614_v6  ;;  %2308 = vmatprep.mubr.msk.bf16.mxu0 %vm2523_vm1, %v2522_v8 }
 0xde9   :  { %2285 = vmatmul.mubr.msk.bf16.vlgmr.msra.gmra.mxu1 %vm134_vm0, %v1232_v19  ;;  %2306 = vmatprep.subr.bf16.mxu0 %v2522_v8 }
 0xdea   :  { %2297 = vmatpush3.bf16.msra.mxu1 %v2774_v53  ;;  %2300 = vmatprep.mubr.msk.bf16.mxu1 %vm2523_vm1, %v2522_v8 }
 0xdeb   :  { %2298 = vmatprep.subr.bf16.mxu1 %v2522_v8 }
 0xdec   :  { %2307 = vmatpush3.bf16.msra.mxu0 %v2623_v9 }
 0xded   :  { %2320 = vmatprep.subr.bf16.mxu0 %v2522_v8 }
 0xdee   :  { %2299 = vmatpush3.bf16.msra.mxu1 %v2780_v56 }
 0xdef   :  { %2309 = vmatmul.mubr.msk.bf16.vlgmr.msra.gmra.mxu0 %vm134_vm0, %v1386_v20  ;;  %2312 = vmatprep.subr.bf16.mxu1 %v2522_v8 }
 0xdf0   :  { %2321 = vmatpush3.bf16.msra.mxu0 %v2674_v49  ;;  %2324 = vmatprep.mubr.msk.bf16.mxu0 %vm2523_vm1, %v2522_v8 }
 0xdf1   :  { %2322 = vmatprep.subr.bf16.mxu0 %v2522_v8 }
 0xdf4   :  { %2323 = vmatpush3.bf16.msra.mxu0 %v2680_v50 }
 0xdf5   :  { %2336 = vmatprep.subr.bf16.mxu0 %v2522_v8 }
 0xea1   :  { %v2979_v6 = vpop.f32.mrf.mxu1 }
 0xea3   :  { %v2270_v9 = vpop.f32.mrf.mxu1 }
 0xea5   :  { %v1273_v40 = vpop.f32.mrf.mxu1 }
 0xea7   :  { %v2271_v41 = vpop.f32.mrf.mxu1  ;;  %v1424_v42 = vpop.f32.mrf.mxu0 }
 0xea8   :  { %v1425_v43 = vadd.f32 %v2750_v12, %v1424_v42 }
 0xea9   :  { %v1378_v44 = vpop.f32.mrf.mxu1  ;;  %v2294_v47 = vpop.f32.mrf.mxu0 }
 0xeaa   :  { %v1430_v13 = vadd.f32 %v1425_v43, %v1378_v44  ;;  %v2470_v43 = vld [vmem:[%s3101_s3 + $0x8] sm:$0xff]  }
 0xeab   :  { %v2286_v48 = vpop.f32.mrf.mxu1  ;;  %v1427_v54 = vpop.f32.mrf.mxu0 }
 0xeac   :  { %v1431_v45 = vmul.f32 %v1430_v13, %v2655_v30 }
 0xead   :  { %v1381_v57 = vpop.f32.mrf.mxu1  ;;  %v2295_v58 = vpop.f32.mrf.mxu0 }
 0xeae   :  { %2436 = vtanh.f32 %v1431_v45 }
 0xeaf   :  { %v2287_v1 = vpop.f32.mrf.mxu1  ;;  %v1538_v17 = vpop.f32.mrf.mxu0 }
 0xeb0   :  { %v1544_v4 = vadd.f32 %v1538_v17, %v2653_v28 }
 0xeb1   :  { %v2310_v7 = vpop.f32.mrf.mxu0 }
 0xeb2   :  { %v1545_v10 = vmul.f32 %v1544_v4, %v2655_v30 }
 0xeb3   :  { %v1541_v14 = vpop.f32.mrf.mxu0 }
 0xeb4   :  { %2438 = vtanh.f32 %v1545_v10 }
 0xeb5   :  { %v2311_v46 = vpop.f32.mrf.mxu0 }
 0xebb   :  { %v2437_v16 = vpop.eup %2436 }
 0xebc   :  { %v1433_v24 = vmul.f32 %v2437_v16, %v2655_v30 }
 0xebe   :  { %v1434_v18 = vadd.f32 %v1433_v24, %v2658_v38 }
 0xec0   :  { %1437 = vrot.lane.b32.xlu0 %v1434_v18, %s2519_s22  ;;  %v1435_v5 = vmul.f32 %v1434_v18, %v2940_v26 }
 0xec1   :  { %v2439_v51 = vpop.eup %2438 }
 0xec2   :  { %v1547_v21 = vmul.f32 %v2439_v51, %v2655_v30 }
 0xec4   :  { %v1548_v25 = vadd.f32 %v1547_v21, %v2658_v38 }
 0xec6   :  { %1551 = vrot.lane.b32.xlu1 %v1548_v25, %s2519_s22  ;;  %v1549_v15 = vmul.f32 %v1548_v25, %v2944_v31 }
 0xf32   :  { %v1438_v28 = vpop.permute.xlu0 %1437 }
 0xf33   :  { %v1440_v59 = vmul.f32 %v1438_v28, %v1434_v18 }
 0xf35   :  { %1442 = vrot.lane.b32.xlu0 %v1440_v59, %s2525_s0 }
 0xf38   :  { %v1552_v27 = vpop.permute.xlu1 %1551 }
 0xf39   :  { %v1554_v29 = vmul.f32 %v1552_v27, %v1548_v25 }
 0xf3b   :  { %1556 = vrot.lane.b32.xlu1 %v1554_v29, %s2525_s0 }
 0xfa7   :  { %v1443_v32 = vpop.permute.xlu0 %1442 }
 0xfa8   :  { %v2994_v34 = vadd.f32 %v1443_v32, %v1435_v5 }
 0xfaa   :  { %2440 = vtanh.f32 %v2994_v34 }
 0xfad   :  { %v1557_v35 = vpop.permute.xlu1 %1556 }
 0xfae   :  { %v2998_v36 = vadd.f32 %v1557_v35, %v1549_v15 }
 0xfb0   :  { %2442 = vtanh.f32 %v2998_v36 }
 0xfb7   :  { %v2441_v37 = vpop.eup %2440 }
 0xfb8   :  { %1448 = vrot.lane.b32.xlu0 %v2441_v37, %s2519_s22 }
 0xfbd   :  { %v2443_v39 = vpop.eup %2442 }
 0xfbe   :  { %1562 = vrot.lane.b32.xlu1 %v2443_v39, %s2519_s22 }
0x102a   :  { %v1449_v19 = vpop.permute.xlu0 %1448 }
0x102b   :  { %v1451_v26 = vmul.f32 %v1449_v19, %v1434_v18 }
0x102d   :  { %v1452_v20 = vpack.c.bf16 %v1451_v26, %v1451_v26 }
0x102f   :  { %1454 = vrot.lane.b32.xlu0 %v1452_v20, %s2525_s0 }
0x1030   :  { %v1563_v9 = vpop.permute.xlu1 %1562 }
0x1031   :  { %v1565_v40 = vmul.f32 %v1563_v9, %v1548_v25 }
0x1033   :  { %v1566_v41 = vpack.c.bf16 %v1565_v40, %v1565_v40 }
0x1035   :  { %1608 = vrot.lane.b32.xlu1 %v1566_v41, %s2525_s0 }
0x10a1   :  { %v1455_v31 = vpop.permute.xlu0 %1454 }
0x10a2   :  { %2301 = vmatmul.mubr.msk.bf16.vlgmr.msra.gmra.mxu1 %vm134_vm0, %v1455_v31 }
0x10a3   :  { %2313 = vmatpush3.bf16.msra.mxu1 %v2689_v52  ;;  %2316 = vmatprep.mubr.msk.bf16.mxu1 %vm2523_vm1, %v2522_v8  ;;  %v2471_v52 = vld [vmem:[%s3101_s3] sm:$0xff]  }
0x10a4   :  { %2314 = vmatprep.subr.bf16.mxu1 %v2522_v8 }
0x10a7   :  { %2315 = vmatpush3.bf16.msra.mxu1 %v2704_v55  ;;  %v1609_v42 = vpop.permute.xlu1 %1608 }
0x10a8   :  { %2325 = vmatmul.mubr.msk.bf16.vlgmr.msra.gmra.mxu0 %vm134_vm0, %v1609_v42  ;;  %2328 = vmatprep.subr.bf16.mxu1 %v2522_v8 }
0x10a9   :  { %2337 = vmatpush3.bf16.msra.mxu0 %v2470_v43  ;;  %2340 = vmatprep.mubr.msk.bf16.mxu0 %vm2523_vm1, %v2522_v8 }
0x10aa   :  { %2317 = vmatmul.mubr.msk.bf16.vlgmr.msra.gmra.mxu1 %vm134_vm0, %v1455_v31  ;;  %2338 = vmatprep.subr.bf16.mxu0 %v2522_v8 }
0x10ab   :  { %2329 = vmatpush3.bf16.msra.mxu1 %v2774_v53  ;;  %2332 = vmatprep.mubr.msk.bf16.mxu1 %vm2523_vm1, %v2522_v8 }
0x10ac   :  { %2330 = vmatprep.subr.bf16.mxu1 %v2522_v8 }
0x10ad   :  { %2339 = vmatpush3.bf16.msra.mxu0 %v2471_v52  ;;  %v2472_v52 = vld [vmem:[%s3104_s6 + $0x8] sm:$0xff]  }
0x10ae   :  { %2352 = vmatprep.subr.bf16.mxu0 %v2522_v8 }
0x10af   :  { %2331 = vmatpush3.bf16.msra.mxu1 %v2780_v56 }
0x10b0   :  { %2341 = vmatmul.mubr.msk.bf16.vlgmr.msra.gmra.mxu0 %vm134_vm0, %v1609_v42  ;;  %2344 = vmatprep.subr.bf16.mxu1 %v2522_v8 }
0x10b1   :  { %2353 = vmatpush3.bf16.msra.mxu0 %v2674_v49  ;;  %2356 = vmatprep.mubr.msk.bf16.mxu0 %vm2523_vm1, %v2522_v8 }
0x10b2   :  { %2354 = vmatprep.subr.bf16.mxu0 %v2522_v8 }
0x10b5   :  { %2355 = vmatpush3.bf16.msra.mxu0 %v2680_v50 }
0x1162   :  { %v3036_v55 = vpop.f32.mrf.mxu1 }
0x1164   :  { %v2302_v44 = vpop.f32.mrf.mxu1 }
0x1165   :  { %v2473_v44 = vld [vmem:[%s3104_s6] sm:$0xff]   ;;  %s2526_s6 = smov [#allocation6]  }
0x1166   :  { %v1496_v47 = vpop.f32.mrf.mxu1 }
0x1168   :  { %v2303_v13 = vpop.f32.mrf.mxu1  ;;  %v1647_v48 = vpop.f32.mrf.mxu0 }
0x1169   :  { %v1648_v54 = vadd.f32 %v2750_v12, %v1647_v48 }
0x116a   :  { %v1601_v45 = vpop.f32.mrf.mxu1  ;;  %v2326_v57 = vpop.f32.mrf.mxu0 }
0x116b   :  { %v1653_v58 = vadd.f32 %v1648_v54, %v1601_v45 }
0x116c   :  { %v2318_v1 = vpop.f32.mrf.mxu1  ;;  %v1650_v49 = vpop.f32.mrf.mxu0 }
0x116d   :  { %v1654_v17 = vmul.f32 %v1653_v58, %v2655_v30 }
0x116e   :  { %v1604_v4 = vpop.f32.mrf.mxu1  ;;  %v2327_v7 = vpop.f32.mrf.mxu0 }
0x116f   :  { %2444 = vtanh.f32 %v1654_v17 }
0x1170   :  { %v2319_v10 = vpop.f32.mrf.mxu1  ;;  %v1761_v50 = vpop.f32.mrf.mxu0 }
0x1171   :  { %v1767_v14 = vadd.f32 %v1761_v50, %v2649_v22 }
0x1172   :  { %v2342_v46 = vpop.f32.mrf.mxu0 }
0x1173   :  { %v1768_v16 = vmul.f32 %v1767_v14, %v2655_v30 }
0x1174   :  { %v1764_v24 = vpop.f32.mrf.mxu0 }
0x1175   :  { %2446 = vtanh.f32 %v1768_v16 }
0x1176   :  { %v2343_v18 = vpop.f32.mrf.mxu0 }
0x117c   :  { %v2445_v51 = vpop.eup %2444 }
0x117d   :  { %v1656_v21 = vmul.f32 %v2445_v51, %v2655_v30 }
0x117f   :  { %v1657_v25 = vadd.f32 %v1656_v21, %v2658_v38 }
0x1181   :  { %1660 = vrot.lane.b32.xlu0 %v1657_v25, %s2519_s22  ;;  %v1658_v15 = vmul.f32 %v1657_v25, %v2994_v34 }
0x1182   :  { %v2447_v28 = vpop.eup %2446 }
0x1183   :  { %v1770_v59 = vmul.f32 %v2447_v28, %v2655_v30 }
0x1185   :  { %v1771_v27 = vadd.f32 %v1770_v59, %v2658_v38 }
0x1187   :  { %1774 = vrot.lane.b32.xlu1 %v1771_v27, %s2519_s22  ;;  %v1772_v39 = vmul.f32 %v1771_v27, %v2998_v36 }
0x11f3   :  { %v1661_v22 = vpop.permute.xlu0 %1660 }
0x11f4   :  { %v1663_v29 = vmul.f32 %v1661_v22, %v1657_v25 }
0x11f6   :  { %1665 = vrot.lane.b32.xlu0 %v1663_v29, %s2525_s0 }
0x11f9   :  { %v1775_v5 = vpop.permute.xlu1 %1774 }
0x11fa   :  { %v1777_v32 = vmul.f32 %v1775_v5, %v1771_v27 }
0x11fc   :  { %1779 = vrot.lane.b32.xlu1 %v1777_v32, %s2525_s0 }
0x1268   :  { %v1666_v35 = vpop.permute.xlu0 %1665 }
0x1269   :  { %v1668_v37 = vadd.f32 %v1666_v35, %v1658_v15 }
0x126b   :  { %2448 = vtanh.f32 %v1668_v37 }
0x126e   :  { %v1780_v19 = vpop.permute.xlu1 %1779 }
0x126f   :  { %v1782_v26 = vadd.f32 %v1780_v19, %v1772_v39 }
0x1271   :  { %2450 = vtanh.f32 %v1782_v26 }
0x1278   :  { %v2449_v20 = vpop.eup %2448 }
0x1279   :  { %1671 = vrot.lane.b32.xlu0 %v2449_v20, %s2519_s22 }
0x127e   :  { %v2451_v9 = vpop.eup %2450 }
0x127f   :  { %1785 = vrot.lane.b32.xlu1 %v2451_v9, %s2519_s22 }
0x12eb   :  { %v1672_v40 = vpop.permute.xlu0 %1671 }
0x12ec   :  { %v1674_v41 = vmul.f32 %v1672_v40, %v1657_v25  ;;  %v1979_v25 = vld [vmem:[#allocation2] ss:$0 sm:$0xff] }
0x12ee   :  { %v1675_v31 = vpack.c.bf16 %v1674_v41, %v1674_v41 }
0x12f0   :  { %1677 = vrot.lane.b32.xlu0 %v1675_v31, %s2525_s0 }
0x12f1   :  { %v1786_v34 = vpop.permute.xlu1 %1785 }
0x12f2   :  { %v1788_v42 = vmul.f32 %v1786_v34, %v1771_v27 }
0x12f4   :  { %v1789_v43 = vpack.c.bf16 %v1788_v42, %v1788_v42 }
0x12f6   :  { %1831 = vrot.lane.b32.xlu1 %v1789_v43, %s2525_s0 }
0x1362   :  { %v1678_v36 = vpop.permute.xlu0 %1677 }
0x1363   :  { %2333 = vmatmul.mubr.msk.bf16.vlgmr.msra.gmra.mxu1 %vm134_vm0, %v1678_v36 }
0x1364   :  { %2345 = vmatpush3.bf16.msra.mxu1 %v2472_v52  ;;  %2348 = vmatprep.mubr.msk.bf16.mxu1 %vm2523_vm1, %v2522_v8 }
0x1365   :  { %2346 = vmatprep.subr.bf16.mxu1 %v2522_v8 }
0x1368   :  { %2347 = vmatpush3.bf16.msra.mxu1 %v2473_v44  ;;  %v1832_v47 = vpop.permute.xlu1 %1831 }
0x1369   :  { %2357 = vmatmul.mubr.msk.bf16.vlgmr.msra.gmra.mxu0 %vm134_vm0, %v1832_v47  ;;  %2360 = vmatprep.subr.bf16.mxu1 %v2522_v8 }
0x136b   :  { %2349 = vmatmul.mubr.msk.bf16.vlgmr.msra.gmra.mxu1 %vm134_vm0, %v1678_v36 }
0x136c   :  { %2361 = vmatpush3.bf16.msra.mxu1 %v2774_v53  ;;  %2364 = vmatprep.mubr.msk.bf16.mxu1 %vm2523_vm1, %v2522_v8 }
0x136d   :  { %2362 = vmatprep.subr.bf16.mxu1 %v2522_v8 }
0x1370   :  { %2363 = vmatpush3.bf16.msra.mxu1 %v2780_v56 }
0x1423   :  { %v1716_v13 = vpop.f32.mrf.mxu1 }
0x1425   :  { %v2334_v48 = vpop.f32.mrf.mxu1 }
0x1427   :  { %v1719_v54 = vpop.f32.mrf.mxu1 }
0x1429   :  { %v2335_v45 = vpop.f32.mrf.mxu1  ;;  %v1870_v57 = vpop.f32.mrf.mxu0 }
0x142a   :  { %v1871_v58 = vadd.f32 %v2750_v12, %v1870_v57 }
0x142b   :  { %v1824_v1 = vpop.f32.mrf.mxu1  ;;  %v2358_v49 = vpop.f32.mrf.mxu0 }
0x142c   :  { %v1876_v17 = vadd.f32 %v1871_v58, %v1824_v1 }
0x142d   :  { %v2350_v4 = vpop.f32.mrf.mxu1  ;;  %v1873_v7 = vpop.f32.mrf.mxu0 }
0x142e   :  { %v1877_v53 = vmul.f32 %v1876_v17, %v2655_v30 }
0x142f   :  { %v1827_v10 = vpop.f32.mrf.mxu1  ;;  %v2359_v50 = vpop.f32.mrf.mxu0 }
0x1430   :  { %2452 = vtanh.f32 %v1877_v53 }
0x1431   :  { %v2351_v8 = vpop.f32.mrf.mxu1 }
0x143d   :  { %v2453_v14 = vpop.eup %2452 }
0x143e   :  { %v1879_v56 = vmul.f32 %v2453_v14, %v2655_v30 }
0x1440   :  { %v1880_v46 = vadd.f32 %v1879_v56, %v2658_v38 }
0x1442   :  { %1883 = vrot.lane.b32.xlu0 %v1880_v46, %s2519_s22  ;;  %v1881_v24 = vmul.f32 %v1880_v46, %v1668_v37 }
0x14b4   :  { %v1884_v16 = vpop.permute.xlu0 %1883 }
0x14b5   :  { %v1886_v12 = vmul.f32 %v1884_v16, %v1880_v46 }
0x14b7   :  { %1888 = vrot.lane.b32.xlu1 %v1886_v12, %s2525_s0 }
0x1529   :  { %v1889_v18 = vpop.permute.xlu1 %1888 }
0x152a   :  { %v1891_v51 = vadd.f32 %v1889_v18, %v1881_v24 }
0x152c   :  { %2454 = vtanh.f32 %v1891_v51 }
0x1539   :  { %v2455_v21 = vpop.eup %2454 }
0x153a   :  { %1894 = vrot.lane.b32.xlu0 %v2455_v21, %s2519_s22  ;;  %s1955_s22 = sshll.u32 %s2526_s6, 4  ;;  %s1956_s22 = int_to_ptr.vmem [resolvable:$true] %s1955_s22 }
0x153b   :  { %p2499_p6 = scmp.lt.s32.totalorder %s1956_s22, %s1956_s22 }
0x153e   :  { %229 = vperm.xlu0 %2379, %v1979_v25  }
0x15ac   :  { %v1895_v28 = vpop.permute.xlu0 %1894 }
0x15ad   :  { %v1897_v59 = vmul.f32 %v1895_v28, %v1880_v46 }
0x15af   :  { %v1898_v30 = vpack.c.bf16 %v1897_v59, %v1897_v59 }
0x15b1   :  { %1900 = vrot.lane.b32.xlu1 %v1898_v30, %s2525_s0  ;;  %s2494_s0 = scalar_lea.vmem %s1956_s22, 896 }
0x15b2   :  { %p2495_p5 = scmp.ne.s32.totalorder %s1956_s22, %s2494_s0  ;;  %p2500_p7 = scmp.lt.s32.totalorder %s2494_s0, %s2494_s0 }
0x15b4   :  { %p2501_p8 = por %p2500_p7, %p2499_p6 }
0x15b6   :  { %p2502_p9 = pnand %p2501_p8, %p2495_p5 }
0x15b9   :  { %v230_v38 = vpop.permute.xlu0 %229 }
0x15ba   :  { %v309_v27 = vadd.f32 %v2721_v61, %v230_v38  ;;  %v317_v22 = vadd.f32 %v2719_v60, %v230_v38  ;;  %v312_v29 = vadd.f32 %v2725_v63, %v230_v38  ;;  %v320_v5 = vadd.f32 %v2723_v62, %v230_v38 }
0x15bb   :  { %v325_v32 = vadd.f32 %v2729_v2, %v230_v38  ;;  %v328_v15 = vadd.f32 %v2731_v3, %v230_v38  ;;  %v333_v45 = vadd.f32 %v2727_v0, %v230_v38 }
0x15bc   :  { %v602_v35 = vadd.f32 %v2817_v11, %v309_v27  ;;  %v825_v37 = vadd.f32 %v2871_v23, %v312_v29  ;;  %v1048_v39 = vadd.f32 %v2925_v33, %v317_v22  ;;  %v1271_v19 = vadd.f32 %v2979_v6, %v320_v5 }
0x15bd   :  { %v1494_v61 = vadd.f32 %v3036_v55, %v325_v32  ;;  %v1717_v26 = vadd.f32 %v1716_v13, %v328_v15 }
0x15be   :  { %v607_v60 = vmul.f32 0.5, %v602_v35  ;;  %v830_v20 = vmul.f32 0.5, %v825_v37  ;;  %v1053_v63 = vmul.f32 0.5, %v1048_v39  ;;  %v1276_v9 = vmul.f32 0.5, %v1271_v19 }
0x15bf   :  { %v1499_v62 = vmul.f32 0.5, %v1494_v61  ;;  %v1722_v2 = vmul.f32 0.5, %v1717_v26 }
0x15c0   :  { %2456 = vtanh.f32 %v607_v60 }
0x15c1   :  { %2458 = vtanh.f32 %v830_v20 }
0x15c2   :  { %2460 = vtanh.f32 %v1053_v63 }
0x15c3   :  { %2462 = vtanh.f32 %v1276_v9 }
0x15c4   :  { %2464 = vtanh.f32 %v1499_v62 }
0x15c5   :  { %2466 = vtanh.f32 %v1722_v2 }
0x15cd   :  { %v2457_v3 = vpop.eup %2456 }
0x15ce   :  { %v2459_v11 = vpop.eup %2458  ;;  %v609_v23 = vmul.f32 0.5, %v2457_v3 }
0x15cf   :  { %v2461_v33 = vpop.eup %2460  ;;  %v832_v6 = vmul.f32 0.5, %v2459_v11 }
0x15d0   :  { %v2463_v40 = vpop.eup %2462  ;;  %v610_v55 = vadd.f32 0.5, %v609_v23  ;;  %v1055_v41 = vmul.f32 0.5, %v2461_v33 }
0x15d1   :  { %v2465_v31 = vpop.eup %2464  ;;  %v833_v34 = vadd.f32 0.5, %v832_v6  ;;  %v1278_v42 = vmul.f32 0.5, %v2463_v40 }
0x15d2   :  { %v2467_v43 = vpop.eup %2466  ;;  %611 = vst [vmem:[#allocation6] sm:$0xff] %v610_v55  ;;  %v1056_v36 = vadd.f32 0.5, %v1055_v41  ;;  %v1501_v52 = vmul.f32 0.5, %v2465_v31 }
0x15d3   :  { %834 = vst [vmem:[#allocation6 + $0x8] sm:$0xff] %v833_v34  ;;  %v1279_v44 = vadd.f32 0.5, %v1278_v42  ;;  %v1724_v47 = vmul.f32 0.5, %v2467_v43 }
0x15d4   :  { %1057 = vst [vmem:[#allocation6 + $0x10] sm:$0xff] %v1056_v36  ;;  %v1502_v13 = vadd.f32 0.5, %v1501_v52 }
0x15d5   :  { %1280 = vst [vmem:[#allocation6 + $0x18] sm:$0xff] %v1279_v44  ;;  %v1725_v48 = vadd.f32 0.5, %v1724_v47 }
0x15d6   :  { %1503 = vst [vmem:[#allocation6 + $0x20] sm:$0xff] %v1502_v13 }
0x15d7   :  { %1726 = vst [vmem:[#allocation6 + $0x28] sm:$0xff] %v1725_v48 }
0x1623   :  { %v1901_v54 = vpop.permute.xlu1 %1900 }
0x1624   :  { %2365 = vmatmul.mubr.msk.bf16.vlgmr.msra.gmra.mxu1 %vm134_vm0, %v1901_v54 }
0x16e4   :  { %v1939_v57 = vpop.f32.mrf.mxu1 }
0x16e5   :  { %v1940_v58 = vadd.f32 %v1939_v57, %v333_v45 }
0x16e6   :  { %v2366_v1 = vpop.f32.mrf.mxu1 }
0x16e7   :  { %v1945_v49 = vmul.f32 0.5, %v1940_v58 }
0x16e8   :  { %v1942_v17 = vpop.f32.mrf.mxu1 }
0x16e9   :  { %2468 = vtanh.f32 %v1945_v49 }
0x16ea   :  { %v2367_v4 = vpop.f32.mrf.mxu1 }
0x16f6   :  { %v2469_v7 = vpop.eup %2468 }
0x16f7   :  { %v1947_v53 = vmul.f32 0.5, %v2469_v7 }
0x16f9   :  { %v1948_v10 = vadd.f32 0.5, %v1947_v53 }
0x16fb   :  { %1949 = vst [vmem:[#allocation6 + $0x30] sm:$0xff] %v1948_v10 }
0x16fc   :  { %2505 = shalt.err (!%p2502_p9)
}
0x16fd   :  { %s2527_s25 = smov 128   ;;  %s2528_s10 = smov 8  }
0x16fe   :  { %1961 = dma.vmem_to_hbm [thread:$0]  %s1956_s22, 896, %s3109_s11, [#allocation5], %s2527_s25, %s2527_s25, %s2528_s10  }
0x16ff   :  { %2516 = dma.done.wait [#allocation5], 896  }
0x1700   :  { %2517 = vsyncadd [#allocation5], 4294966400 }
0x1701   :  { %1965 = vsyncpa [#allocation4], 1 }
0x1702   :  { %1966 = vsyncpa [#allocation5], 1 }

</bundles_post_ra>
